<compile_context>
chip_gen: v7x
topology: tpu7x:2x2x1
jax: 0.10.0
libtpu: 0.0.40
codegen_flags: <defaults>
</compile_context>

<pallas_src>
import math

import jax
import jax.numpy as jnp
from jax.experimental import pallas as pl
from jax.experimental.pallas import tpu as pltpu


# ---------------------------------------------------------------------------
# Kernel
# ---------------------------------------------------------------------------
def make_qkv_attn_kernel(heads, attn_ch, tq, full_scale):
    c = attn_ch

    def kernel(qkv_ref, o_ref, kT_sc, v_sc):
        # qkv_ref: (n_ctx, width)             -- dense, VMEM-resident per batch
        # o_ref:   (tq, heads * c)            -- lane-dense output tile
        # kT_sc:   (heads, c, n_ctx) scratch  -- K^T, built once per batch
        # v_sc:    (heads, n_ctx, c) scratch  -- V,   built once per batch
        qt = pl.program_id(1)

        # ---- once per batch: unpack K^T / V into persistent VMEM scratch ----
        # (the misaligned lane sub-slices and the transpose are paid once per
        #  batch here instead of once per query tile)
        @pl.when(qt == 0)
        def _unpack():
            for h in range(heads):
                base = h * 3 * c
                k_h = qkv_ref[:, base + c: base + 2 * c]        # (S, c)
                v_h = qkv_ref[:, base + 2 * c: base + 3 * c]    # (S, c)
                kT_sc[h] = jnp.transpose(k_h)                   # (c, S)
                v_sc[h] = v_h

        # ---- per query tile ----
        q_start = pl.multiple_of(qt * tq, tq)
        q_rows = qkv_ref[pl.ds(q_start, tq), :]                 # (tq, width)

        for h in range(heads):  # static unroll; heads is small
            base = h * 3 * c
            # Fold the softmax scale (scale^2 == 1/sqrt(c)) into q: a (tq, c)
            # multiply instead of a (tq, n_ctx) multiply on the f32 scores.
            q = q_rows[:, base: base + c] * full_scale          # (tq, c)

            # Scores on the MXU, f32 accumulation; K^T comes pre-transposed
            # from scratch (leading-axis index only, no per-step relayout).
            s = jnp.dot(q, kT_sc[h], preferred_element_type=jnp.float32)

            # Numerically stable softmax over the key axis, in float32.
            m = jnp.max(s, axis=-1, keepdims=True)
            e = jnp.exp(s - m)
            denom = jnp.sum(e, axis=-1, keepdims=True)
            inv = pl.reciprocal(denom, approx=True)             # EUP
            inv = inv * (2.0 - denom * inv)                     # Newton step -> near-exact
            w = (e * inv).astype(v_sc.dtype)

            out_h = jnp.dot(w, v_sc[h], preferred_element_type=jnp.float32)
            # Cast per head and write straight into the output tile: no f32
            # concat; only one head's f32 partial is live at a time.
            o_ref[:, h * c:(h + 1) * c] = out_h.astype(o_ref.dtype)

    return kernel


# ---------------------------------------------------------------------------
# Generation-aware parameters
# ---------------------------------------------------------------------------
def _device_params():
    """Returns (mxu_tile_alignment, vmem_limit_bytes or None)."""
    kind = ""
    try:
        kind = jax.devices()[0].device_kind.lower()
    except Exception:
        pass
    is_v7 = ("v7" in kind) or ("7x" in kind)
    is_v6 = "v6" in kind
    is_v5e = ("v5e" in kind) or ("v5 lite" in kind) or ("v5lite" in kind)
    mxu = 256 if (is_v6 or is_v7) else 128
    if is_v7:
        vmem_limit = 48 * 1024 * 1024       # 64 MiB/TC physical -> leave headroom
    elif is_v6 or is_v5e:
        vmem_limit = 100 * 1024 * 1024      # 128 MiB physical parts
    else:
        vmem_limit = None                   # unknown generation: compiler default
    return mxu, vmem_limit


def _round_up(x, m):
    return -(-x // m) * m


def _pick_q_tile(n_ctx, mxu_align, max_tile=512, score_budget_bytes=8 << 20):
    """Largest query tile that divides n_ctx, is MXU/sublane aligned, and keeps
    the live f32 (tq, n_ctx) softmax temporaries within a VMEM budget."""
    if n_ctx <= 8:
        return n_ctx
    cap = score_budget_bytes // (4 * 4 * n_ctx)   # ~4 live f32 (tq, n_ctx) temps
    cap = max(8, min(cap, max_tile, n_ctx))
    for align in (mxu_align, 128, 8):
        if align > cap:
            continue
        t = (cap // align) * align
        while t >= align:
            if n_ctx % t == 0:
                return t
            t -= align
    return n_ctx  # fall back: one tile spanning the full axis (always legal)


# ---------------------------------------------------------------------------
# Wrapper
# ---------------------------------------------------------------------------
def qkv_multihead_attention(qkv, heads, *, q_tile=None):
    """Pallas forward pass of QKVMultiheadAttention.

    qkv: (bs, n_ctx, width) with width == heads * 3 * attn_ch.
    returns (bs, n_ctx, heads * attn_ch).
    """
    bs, n_ctx, width = qkv.shape
    assert width % (3 * heads) == 0, "width must be divisible by 3 * heads"
    attn_ch = width // (3 * heads)
    out_width = heads * attn_ch
    scale = 1.0 / math.sqrt(math.sqrt(attn_ch))
    full_scale = float(scale * scale)  # == 1 / sqrt(attn_ch)

    mxu_align, vmem_limit = _device_params()
    tq = _pick_q_tile(n_ctx, mxu_align) if q_tile is None else q_tile
    assert n_ctx % tq == 0, "q_tile must divide n_ctx"
    assert tq % 8 == 0 or tq == n_ctx
    n_qt = n_ctx // tq

    itemsize = qkv.dtype.itemsize
    if vmem_limit is not None:
        est = (
            2 * _round_up(n_ctx, 8) * _round_up(width, 128) * itemsize          # double-buffered resident QKV
            + heads * _round_up(attn_ch, 8) * _round_up(n_ctx, 128) * itemsize  # K^T scratch
            + heads * _round_up(n_ctx, 8) * _round_up(attn_ch, 128) * itemsize  # V scratch
            + 2 * _round_up(tq, 8) * _round_up(out_width, 128) * itemsize       # double-buffered output tile
            + 4 * tq * _round_up(n_ctx, 128) * 4                                # live f32 softmax temporaries
        )
        if est > vmem_limit:
            # TODO(synk): flash-style online-softmax tiling of the key axis for
            # very long n_ctx (full-sequence K/V residency no longer fits VMEM).
            raise ValueError(
                f"QKV attention working set (~{est >> 20} MiB) exceeds the VMEM "
                f"budget ({vmem_limit >> 20} MiB); reduce n_ctx/q_tile or add "
                "key-axis tiling.")

    cost = pl.CostEstimate(
        flops=int(4 * bs * heads * n_ctx * n_ctx * attn_ch),       # QK^T + PV
        transcendentals=int(bs * heads * n_ctx * n_ctx),           # exp
        bytes_accessed=int(qkv.size * itemsize + bs * n_ctx * out_width * itemsize),
    )

    grid_spec = pltpu.PrefetchScalarGridSpec(
        num_scalar_prefetch=0,
        grid=(bs, n_qt),
        in_specs=[
            # Dense full-sequence fused QKV for batch b; block index constant
            # along the query-tile axis -> fetched once per batch, resident.
            pl.BlockSpec((None, n_ctx, width), lambda b, qt: (b, 0, 0)),
        ],
        out_specs=pl.BlockSpec((None, tq, out_width), lambda b, qt: (b, qt, 0)),
        scratch_shapes=[
            pltpu.VMEM((heads, attn_ch, n_ctx), qkv.dtype),   # K^T (per batch)
            pltpu.VMEM((heads, n_ctx, attn_ch), qkv.dtype),   # V   (per batch)
        ],
    )

    cp_kwargs = dict(dimension_semantics=("parallel", "arbitrary"))
    if vmem_limit is not None:
        cp_kwargs["vmem_limit_bytes"] = int(vmem_limit)

    return pl.pallas_call(
        make_qkv_attn_kernel(heads, attn_ch, tq, full_scale),
        out_shape=jax.ShapeDtypeStruct((bs, n_ctx, out_width), qkv.dtype),
        grid_spec=grid_spec,
        compiler_params=pltpu.CompilerParams(**cp_kwargs),
        cost_estimate=cost,
    )(qkv)


# ---------------------------------------------------------------------------
# Pure-JAX reference matching the PyTorch module (non-flash einsum path).
# ---------------------------------------------------------------------------
def reference(qkv, heads):
    bs, n_ctx, width = qkv.shape
    attn_ch = width // heads // 3
    scale = 1.0 / math.sqrt(math.sqrt(attn_ch))
    qkv4 = qkv.reshape(bs, n_ctx, heads, -1)
    q = qkv4[..., :attn_ch]
    k = qkv4[..., attn_ch:2 * attn_ch]
    v = qkv4[..., 2 * attn_ch:]
    w = jnp.einsum("bthc,bshc->bhts", q * scale, k * scale,
                   precision=jax.lax.Precision.HIGHEST)
    w = jax.nn.softmax(w.astype(jnp.float32), axis=-1).astype(w.dtype)
    out = jnp.einsum("bhts,bshc->bthc", w, v,
                     precision=jax.lax.Precision.HIGHEST)
    return out.reshape(bs, n_ctx, heads * attn_ch)


if __name__ == "__main__":
    bs, n_ctx, heads, attn_ch = 2, 128, 4, 32
    width = heads * 3 * attn_ch  # 384

    key = jax.random.PRNGKey(0)
    qkv = jax.random.normal(key, (bs, n_ctx, width), jnp.float32)

    # q_tile=64 -> grid (2, 2): exercises the once-per-batch K^T/V unpack, the
    # resident-block revisit, and the dynamic query-tile offset path.
    out = qkv_multihead_attention(qkv, heads, q_tile=64)
    out = jax.block_until_ready(out)

    ref = reference(qkv, heads)
    assert out.shape == (bs, n_ctx, heads * attn_ch)
    err = float(jnp.max(jnp.abs(out - ref)))
    assert jnp.allclose(out, ref, rtol=2e-3, atol=2e-3), \
        f"mismatch vs reference (max abs err {err})"

    print("KERNEL_OK")
</pallas_src>

<mosaic_0001>
module attributes {stable_mosaic.version = 11 : i64} {
  func.func @kernel(%arg0: i32, %arg1: i32, %arg2: memref<1x128x384xf32, #tpu.memory_space<vmem>>, %arg3: memref<1x64x128xf32, #tpu.memory_space<vmem>>, %arg4: memref<4x32x128xf32, #tpu.memory_space<vmem>>, %arg5: memref<4x128x32xf32, #tpu.memory_space<vmem>>) attributes {dimension_semantics = [#tpu.dimension_semantics<parallel>, #tpu.dimension_semantics<arbitrary>], iteration_bounds = array<i64: 2, 2>, scalar_prefetch = 0 : i64, scratch_operands = 2 : i64, tpu.core_type = #tpu.core_type<tc>, window_params = [{transform_indices = @transform_0, window_bounds = array<i64: 1, 128, 384>}, {transform_indices = @transform_1, window_bounds = array<i64: 1, 64, 128>}]} {
    %c0_i32 = arith.constant 0 : i32
    %0 = arith.cmpi eq, %arg1, %c0_i32 : i32
    %1 = arith.extui %0 : i1 to i32
    %c0_i32_0 = arith.constant 0 : i32
    %2 = arith.cmpi ne, %1, %c0_i32_0 : i32
    scf.if %2 {
      %c0_55 = arith.constant 0 : index
      %c0_56 = arith.constant 0 : index
      %c32_57 = arith.constant 32 : index
      %112 = vector.load %arg2[%c0_55, %c0_56, %c32_57] : memref<1x128x384xf32, #tpu.memory_space<vmem>>, vector<1x128x32xf32>
      %113 = vector.shape_cast %112 : vector<1x128x32xf32> to vector<128x32xf32>
      %c0_58 = arith.constant 0 : index
      %c0_59 = arith.constant 0 : index
      %c64_60 = arith.constant 64 : index
      %114 = vector.load %arg2[%c0_58, %c0_59, %c64_60] : memref<1x128x384xf32, #tpu.memory_space<vmem>>, vector<1x128x32xf32>
      %115 = vector.shape_cast %114 : vector<1x128x32xf32> to vector<128x32xf32>
      %116 = tpu.transpose %113, [1, 0] : vector<128x32xf32> -> vector<32x128xf32>
      %c0_61 = arith.constant 0 : index
      %c0_62 = arith.constant 0 : index
      %c0_63 = arith.constant 0 : index
      %117 = vector.load %arg4[%c0_61, %c0_62, %c0_63] : memref<4x32x128xf32, #tpu.memory_space<vmem>>, vector<1x32x128xf32>
      %118 = vector.shape_cast %117 : vector<1x32x128xf32> to vector<32x128xf32>
      %119 = vector.shape_cast %116 : vector<32x128xf32> to vector<1x32x128xf32>
      tpu.vector_store %arg4[%c0_61, %c0_62, %c0_63], %119 {strides = array<i32>} : memref<4x32x128xf32, #tpu.memory_space<vmem>>, vector<1x32x128xf32>,
      %c0_64 = arith.constant 0 : index
      %c0_65 = arith.constant 0 : index
      %c0_66 = arith.constant 0 : index
      %120 = vector.load %arg5[%c0_64, %c0_65, %c0_66] : memref<4x128x32xf32, #tpu.memory_space<vmem>>, vector<1x128x32xf32>
      %121 = vector.shape_cast %120 : vector<1x128x32xf32> to vector<128x32xf32>
      %122 = vector.shape_cast %115 : vector<128x32xf32> to vector<1x128x32xf32>
      tpu.vector_store %arg5[%c0_64, %c0_65, %c0_66], %122 {strides = array<i32>} : memref<4x128x32xf32, #tpu.memory_space<vmem>>, vector<1x128x32xf32>,
      %c0_67 = arith.constant 0 : index
      %c0_68 = arith.constant 0 : index
      %c128 = arith.constant 128 : index
      %123 = vector.load %arg2[%c0_67, %c0_68, %c128] : memref<1x128x384xf32, #tpu.memory_space<vmem>>, vector<1x128x32xf32>
      %124 = vector.shape_cast %123 : vector<1x128x32xf32> to vector<128x32xf32>
      %c0_69 = arith.constant 0 : index
      %c0_70 = arith.constant 0 : index
      %c160 = arith.constant 160 : index
      %125 = vector.load %arg2[%c0_69, %c0_70, %c160] : memref<1x128x384xf32, #tpu.memory_space<vmem>>, vector<1x128x32xf32>
      %126 = vector.shape_cast %125 : vector<1x128x32xf32> to vector<128x32xf32>
      %127 = tpu.transpose %124, [1, 0] : vector<128x32xf32> -> vector<32x128xf32>
      %c1_71 = arith.constant 1 : index
      %c0_72 = arith.constant 0 : index
      %c0_73 = arith.constant 0 : index
      %128 = vector.load %arg4[%c1_71, %c0_72, %c0_73] : memref<4x32x128xf32, #tpu.memory_space<vmem>>, vector<1x32x128xf32>
      %129 = vector.shape_cast %128 : vector<1x32x128xf32> to vector<32x128xf32>
      %130 = vector.shape_cast %127 : vector<32x128xf32> to vector<1x32x128xf32>
      tpu.vector_store %arg4[%c1_71, %c0_72, %c0_73], %130 {strides = array<i32>} : memref<4x32x128xf32, #tpu.memory_space<vmem>>, vector<1x32x128xf32>,
      %c1_74 = arith.constant 1 : index
      %c0_75 = arith.constant 0 : index
      %c0_76 = arith.constant 0 : index
      %131 = vector.load %arg5[%c1_74, %c0_75, %c0_76] : memref<4x128x32xf32, #tpu.memory_space<vmem>>, vector<1x128x32xf32>
      %132 = vector.shape_cast %131 : vector<1x128x32xf32> to vector<128x32xf32>
      %133 = vector.shape_cast %126 : vector<128x32xf32> to vector<1x128x32xf32>
      tpu.vector_store %arg5[%c1_74, %c0_75, %c0_76], %133 {strides = array<i32>} : memref<4x128x32xf32, #tpu.memory_space<vmem>>, vector<1x128x32xf32>,
      %c0_77 = arith.constant 0 : index
      %c0_78 = arith.constant 0 : index
      %c224 = arith.constant 224 : index
      %134 = vector.load %arg2[%c0_77, %c0_78, %c224] : memref<1x128x384xf32, #tpu.memory_space<vmem>>, vector<1x128x32xf32>
      %135 = vector.shape_cast %134 : vector<1x128x32xf32> to vector<128x32xf32>
      %c0_79 = arith.constant 0 : index
      %c0_80 = arith.constant 0 : index
      %c256 = arith.constant 256 : index
      %136 = vector.load %arg2[%c0_79, %c0_80, %c256] : memref<1x128x384xf32, #tpu.memory_space<vmem>>, vector<1x128x32xf32>
      %137 = vector.shape_cast %136 : vector<1x128x32xf32> to vector<128x32xf32>
      %138 = tpu.transpose %135, [1, 0] : vector<128x32xf32> -> vector<32x128xf32>
      %c2_81 = arith.constant 2 : index
      %c0_82 = arith.constant 0 : index
      %c0_83 = arith.constant 0 : index
      %139 = vector.load %arg4[%c2_81, %c0_82, %c0_83] : memref<4x32x128xf32, #tpu.memory_space<vmem>>, vector<1x32x128xf32>
      %140 = vector.shape_cast %139 : vector<1x32x128xf32> to vector<32x128xf32>
      %141 = vector.shape_cast %138 : vector<32x128xf32> to vector<1x32x128xf32>
      tpu.vector_store %arg4[%c2_81, %c0_82, %c0_83], %141 {strides = array<i32>} : memref<4x32x128xf32, #tpu.memory_space<vmem>>, vector<1x32x128xf32>,
      %c2_84 = arith.constant 2 : index
      %c0_85 = arith.constant 0 : index
      %c0_86 = arith.constant 0 : index
      %142 = vector.load %arg5[%c2_84, %c0_85, %c0_86] : memref<4x128x32xf32, #tpu.memory_space<vmem>>, vector<1x128x32xf32>
      %143 = vector.shape_cast %142 : vector<1x128x32xf32> to vector<128x32xf32>
      %144 = vector.shape_cast %137 : vector<128x32xf32> to vector<1x128x32xf32>
      tpu.vector_store %arg5[%c2_84, %c0_85, %c0_86], %144 {strides = array<i32>} : memref<4x128x32xf32, #tpu.memory_space<vmem>>, vector<1x128x32xf32>,
      %c0_87 = arith.constant 0 : index
      %c0_88 = arith.constant 0 : index
      %c320 = arith.constant 320 : index
      %145 = vector.load %arg2[%c0_87, %c0_88, %c320] : memref<1x128x384xf32, #tpu.memory_space<vmem>>, vector<1x128x32xf32>
      %146 = vector.shape_cast %145 : vector<1x128x32xf32> to vector<128x32xf32>
      %c0_89 = arith.constant 0 : index
      %c0_90 = arith.constant 0 : index
      %c352 = arith.constant 352 : index
      %147 = vector.load %arg2[%c0_89, %c0_90, %c352] : memref<1x128x384xf32, #tpu.memory_space<vmem>>, vector<1x128x32xf32>
      %148 = vector.shape_cast %147 : vector<1x128x32xf32> to vector<128x32xf32>
      %149 = tpu.transpose %146, [1, 0] : vector<128x32xf32> -> vector<32x128xf32>
      %c3_91 = arith.constant 3 : index
      %c0_92 = arith.constant 0 : index
      %c0_93 = arith.constant 0 : index
      %150 = vector.load %arg4[%c3_91, %c0_92, %c0_93] : memref<4x32x128xf32, #tpu.memory_space<vmem>>, vector<1x32x128xf32>
      %151 = vector.shape_cast %150 : vector<1x32x128xf32> to vector<32x128xf32>
      %152 = vector.shape_cast %149 : vector<32x128xf32> to vector<1x32x128xf32>
      tpu.vector_store %arg4[%c3_91, %c0_92, %c0_93], %152 {strides = array<i32>} : memref<4x32x128xf32, #tpu.memory_space<vmem>>, vector<1x32x128xf32>,
      %c3_94 = arith.constant 3 : index
      %c0_95 = arith.constant 0 : index
      %c0_96 = arith.constant 0 : index
      %153 = vector.load %arg5[%c3_94, %c0_95, %c0_96] : memref<4x128x32xf32, #tpu.memory_space<vmem>>, vector<1x128x32xf32>
      %154 = vector.shape_cast %153 : vector<1x128x32xf32> to vector<128x32xf32>
      %155 = vector.shape_cast %148 : vector<128x32xf32> to vector<1x128x32xf32>
      tpu.vector_store %arg5[%c3_94, %c0_95, %c0_96], %155 {strides = array<i32>} : memref<4x128x32xf32, #tpu.memory_space<vmem>>, vector<1x128x32xf32>,
    } else {
    }
    %c64_i32 = arith.constant 64 : i32
    %3 = arith.muli %arg1, %c64_i32 : i32
    %4 = tpu.assume_multiple %3, 64 : i32
    %c0 = arith.constant 0 : index
    %5 = arith.index_cast %4 : i32 to index
    %c0_1 = arith.constant 0 : index
    %6 = vector.load %arg2[%c0, %5, %c0_1] : memref<1x128x384xf32, #tpu.memory_space<vmem>>, vector<1x64x384xf32>
    %7 = vector.shape_cast %6 : vector<1x64x384xf32> to vector<64x384xf32>
    %8 = vector.extract_strided_slice %7 {offsets = [0, 0], sizes = [64, 32], strides = [1, 1]} : vector<64x384xf32> to vector<64x32xf32>
    %cst = arith.constant 0.176776692 : f32
    %9 = vector.broadcast %cst : f32 to vector<64x32xf32>
    %10 = arith.mulf %8, %9 : vector<64x32xf32>
    %c0_2 = arith.constant 0 : index
    %c0_3 = arith.constant 0 : index
    %c0_4 = arith.constant 0 : index
    %11 = vector.load %arg4[%c0_2, %c0_3, %c0_4] : memref<4x32x128xf32, #tpu.memory_space<vmem>>, vector<1x32x128xf32>
    %12 = vector.shape_cast %11 : vector<1x32x128xf32> to vector<32x128xf32>
    %cst_5 = arith.constant dense<0.000000e+00> : vector<64x128xf32>
    %13 = tpu.matmul %10, %12, %cst_5 {dimension_numbers = #tpu.dot_dimension_numbers<[1], [0], [0], [1], [0, 0, 1, 1], [], []>} : vector<64x32xf32>, vector<32x128xf32>, vector<64x128xf32> -> vector<64x128xf32>
    %cst_6 = arith.constant dense<0xFF800000> : vector<64xf32>
    %14 = vector.multi_reduction <maximumf>, %13, %cst_6 [1] : vector<64x128xf32> to vector<64xf32>
    %15 = vector.shape_cast %14 : vector<64xf32> to vector<64x1xf32>
    %16 = vector.broadcast %15 : vector<64x1xf32> to vector<64x128xf32>
    %17 = arith.subf %13, %16 : vector<64x128xf32>
    %18 = math.exp %17 : vector<64x128xf32>
    %cst_7 = arith.constant dense<0.000000e+00> : vector<64xf32>
    %19 = vector.multi_reduction <add>, %18, %cst_7 [1] : vector<64x128xf32> to vector<64xf32>
    %20 = vector.shape_cast %19 : vector<64xf32> to vector<64x1xf32>
    %21 = tpu.reciprocal %20 {approx = true} : vector<64x1xf32> -> vector<64x1xf32>
    %22 = arith.mulf %20, %21 : vector<64x1xf32>
    %cst_8 = arith.constant 2.000000e+00 : f32
    %23 = vector.broadcast %cst_8 : f32 to vector<64x1xf32>
    %24 = arith.subf %23, %22 : vector<64x1xf32>
    %25 = arith.mulf %21, %24 : vector<64x1xf32>
    %26 = vector.broadcast %25 : vector<64x1xf32> to vector<64x128xf32>
    %27 = arith.mulf %18, %26 : vector<64x128xf32>
    %c0_9 = arith.constant 0 : index
    %c0_10 = arith.constant 0 : index
    %c0_11 = arith.constant 0 : index
    %28 = vector.load %arg5[%c0_9, %c0_10, %c0_11] : memref<4x128x32xf32, #tpu.memory_space<vmem>>, vector<1x128x32xf32>
    %29 = vector.shape_cast %28 : vector<1x128x32xf32> to vector<128x32xf32>
    %cst_12 = arith.constant dense<0.000000e+00> : vector<64x32xf32>
    %30 = tpu.matmul %27, %29, %cst_12 {dimension_numbers = #tpu.dot_dimension_numbers<[1], [0], [0], [1], [0, 0, 1, 1], [], []>} : vector<64x128xf32>, vector<128x32xf32>, vector<64x32xf32> -> vector<64x32xf32>
    %c0_13 = arith.constant 0 : index
    %c0_14 = arith.constant 0 : index
    %c0_15 = arith.constant 0 : index
    %31 = vector.load %arg3[%c0_13, %c0_14, %c0_15] : memref<1x64x128xf32, #tpu.memory_space<vmem>>, vector<1x64x32xf32>
    %32 = vector.shape_cast %31 : vector<1x64x32xf32> to vector<64x32xf32>
    %33 = vector.shape_cast %30 : vector<64x32xf32> to vector<1x64x32xf32>
    tpu.vector_store %arg3[%c0_13, %c0_14, %c0_15], %33 {strides = array<i32>} : memref<1x64x128xf32, #tpu.memory_space<vmem>>, vector<1x64x32xf32>,
    %34 = vector.extract_strided_slice %7 {offsets = [0, 96], sizes = [64, 32], strides = [1, 1]} : vector<64x384xf32> to vector<64x32xf32>
    %cst_16 = arith.constant 0.176776692 : f32
    %35 = vector.broadcast %cst_16 : f32 to vector<64x32xf32>
    %36 = arith.mulf %34, %35 : vector<64x32xf32>
    %c1 = arith.constant 1 : index
    %c0_17 = arith.constant 0 : index
    %c0_18 = arith.constant 0 : index
    %37 = vector.load %arg4[%c1, %c0_17, %c0_18] : memref<4x32x128xf32, #tpu.memory_space<vmem>>, vector<1x32x128xf32>
    %38 = vector.shape_cast %37 : vector<1x32x128xf32> to vector<32x128xf32>
    %cst_19 = arith.constant dense<0.000000e+00> : vector<64x128xf32>
    %39 = tpu.matmul %36, %38, %cst_19 {dimension_numbers = #tpu.dot_dimension_numbers<[1], [0], [0], [1], [0, 0, 1, 1], [], []>} : vector<64x32xf32>, vector<32x128xf32>, vector<64x128xf32> -> vector<64x128xf32>
    %cst_20 = arith.constant dense<0xFF800000> : vector<64xf32>
    %40 = vector.multi_reduction <maximumf>, %39, %cst_20 [1] : vector<64x128xf32> to vector<64xf32>
    %41 = vector.shape_cast %40 : vector<64xf32> to vector<64x1xf32>
    %42 = vector.broadcast %41 : vector<64x1xf32> to vector<64x128xf32>
    %43 = arith.subf %39, %42 : vector<64x128xf32>
    %44 = math.exp %43 : vector<64x128xf32>
    %cst_21 = arith.constant dense<0.000000e+00> : vector<64xf32>
    %45 = vector.multi_reduction <add>, %44, %cst_21 [1] : vector<64x128xf32> to vector<64xf32>
    %46 = vector.shape_cast %45 : vector<64xf32> to vector<64x1xf32>
    %47 = tpu.reciprocal %46 {approx = true} : vector<64x1xf32> -> vector<64x1xf32>
    %48 = arith.mulf %46, %47 : vector<64x1xf32>
    %cst_22 = arith.constant 2.000000e+00 : f32
    %49 = vector.broadcast %cst_22 : f32 to vector<64x1xf32>
    %50 = arith.subf %49, %48 : vector<64x1xf32>
    %51 = arith.mulf %47, %50 : vector<64x1xf32>
    %52 = vector.broadcast %51 : vector<64x1xf32> to vector<64x128xf32>
    %53 = arith.mulf %44, %52 : vector<64x128xf32>
    %c1_23 = arith.constant 1 : index
    %c0_24 = arith.constant 0 : index
    %c0_25 = arith.constant 0 : index
    %54 = vector.load %arg5[%c1_23, %c0_24, %c0_25] : memref<4x128x32xf32, #tpu.memory_space<vmem>>, vector<1x128x32xf32>
    %55 = vector.shape_cast %54 : vector<1x128x32xf32> to vector<128x32xf32>
    %cst_26 = arith.constant dense<0.000000e+00> : vector<64x32xf32>
    %56 = tpu.matmul %53, %55, %cst_26 {dimension_numbers = #tpu.dot_dimension_numbers<[1], [0], [0], [1], [0, 0, 1, 1], [], []>} : vector<64x128xf32>, vector<128x32xf32>, vector<64x32xf32> -> vector<64x32xf32>
    %c0_27 = arith.constant 0 : index
    %c0_28 = arith.constant 0 : index
    %c32 = arith.constant 32 : index
    %57 = vector.load %arg3[%c0_27, %c0_28, %c32] : memref<1x64x128xf32, #tpu.memory_space<vmem>>, vector<1x64x32xf32>
    %58 = vector.shape_cast %57 : vector<1x64x32xf32> to vector<64x32xf32>
    %59 = vector.shape_cast %56 : vector<64x32xf32> to vector<1x64x32xf32>
    tpu.vector_store %arg3[%c0_27, %c0_28, %c32], %59 {strides = array<i32>} : memref<1x64x128xf32, #tpu.memory_space<vmem>>, vector<1x64x32xf32>,
    %60 = vector.extract_strided_slice %7 {offsets = [0, 192], sizes = [64, 32], strides = [1, 1]} : vector<64x384xf32> to vector<64x32xf32>
    %cst_29 = arith.constant 0.176776692 : f32
    %61 = vector.broadcast %cst_29 : f32 to vector<64x32xf32>
    %62 = arith.mulf %60, %61 : vector<64x32xf32>
    %c2 = arith.constant 2 : index
    %c0_30 = arith.constant 0 : index
    %c0_31 = arith.constant 0 : index
    %63 = vector.load %arg4[%c2, %c0_30, %c0_31] : memref<4x32x128xf32, #tpu.memory_space<vmem>>, vector<1x32x128xf32>
    %64 = vector.shape_cast %63 : vector<1x32x128xf32> to vector<32x128xf32>
    %cst_32 = arith.constant dense<0.000000e+00> : vector<64x128xf32>
    %65 = tpu.matmul %62, %64, %cst_32 {dimension_numbers = #tpu.dot_dimension_numbers<[1], [0], [0], [1], [0, 0, 1, 1], [], []>} : vector<64x32xf32>, vector<32x128xf32>, vector<64x128xf32> -> vector<64x128xf32>
    %cst_33 = arith.constant dense<0xFF800000> : vector<64xf32>
    %66 = vector.multi_reduction <maximumf>, %65, %cst_33 [1] : vector<64x128xf32> to vector<64xf32>
    %67 = vector.shape_cast %66 : vector<64xf32> to vector<64x1xf32>
    %68 = vector.broadcast %67 : vector<64x1xf32> to vector<64x128xf32>
    %69 = arith.subf %65, %68 : vector<64x128xf32>
    %70 = math.exp %69 : vector<64x128xf32>
    %cst_34 = arith.constant dense<0.000000e+00> : vector<64xf32>
    %71 = vector.multi_reduction <add>, %70, %cst_34 [1] : vector<64x128xf32> to vector<64xf32>
    %72 = vector.shape_cast %71 : vector<64xf32> to vector<64x1xf32>
    %73 = tpu.reciprocal %72 {approx = true} : vector<64x1xf32> -> vector<64x1xf32>
    %74 = arith.mulf %72, %73 : vector<64x1xf32>
    %cst_35 = arith.constant 2.000000e+00 : f32
    %75 = vector.broadcast %cst_35 : f32 to vector<64x1xf32>
    %76 = arith.subf %75, %74 : vector<64x1xf32>
    %77 = arith.mulf %73, %76 : vector<64x1xf32>
    %78 = vector.broadcast %77 : vector<64x1xf32> to vector<64x128xf32>
    %79 = arith.mulf %70, %78 : vector<64x128xf32>
    %c2_36 = arith.constant 2 : index
    %c0_37 = arith.constant 0 : index
    %c0_38 = arith.constant 0 : index
    %80 = vector.load %arg5[%c2_36, %c0_37, %c0_38] : memref<4x128x32xf32, #tpu.memory_space<vmem>>, vector<1x128x32xf32>
    %81 = vector.shape_cast %80 : vector<1x128x32xf32> to vector<128x32xf32>
    %cst_39 = arith.constant dense<0.000000e+00> : vector<64x32xf32>
    %82 = tpu.matmul %79, %81, %cst_39 {dimension_numbers = #tpu.dot_dimension_numbers<[1], [0], [0], [1], [0, 0, 1, 1], [], []>} : vector<64x128xf32>, vector<128x32xf32>, vector<64x32xf32> -> vector<64x32xf32>
    %c0_40 = arith.constant 0 : index
    %c0_41 = arith.constant 0 : index
    %c64 = arith.constant 64 : index
    %83 = vector.load %arg3[%c0_40, %c0_41, %c64] : memref<1x64x128xf32, #tpu.memory_space<vmem>>, vector<1x64x32xf32>
    %84 = vector.shape_cast %83 : vector<1x64x32xf32> to vector<64x32xf32>
    %85 = vector.shape_cast %82 : vector<64x32xf32> to vector<1x64x32xf32>
    tpu.vector_store %arg3[%c0_40, %c0_41, %c64], %85 {strides = array<i32>} : memref<1x64x128xf32, #tpu.memory_space<vmem>>, vector<1x64x32xf32>,
    %86 = vector.extract_strided_slice %7 {offsets = [0, 288], sizes = [64, 32], strides = [1, 1]} : vector<64x384xf32> to vector<64x32xf32>
    %cst_42 = arith.constant 0.176776692 : f32
    %87 = vector.broadcast %cst_42 : f32 to vector<64x32xf32>
    %88 = arith.mulf %86, %87 : vector<64x32xf32>
    %c3 = arith.constant 3 : index
    %c0_43 = arith.constant 0 : index
    %c0_44 = arith.constant 0 : index
    %89 = vector.load %arg4[%c3, %c0_43, %c0_44] : memref<4x32x128xf32, #tpu.memory_space<vmem>>, vector<1x32x128xf32>
    %90 = vector.shape_cast %89 : vector<1x32x128xf32> to vector<32x128xf32>
    %cst_45 = arith.constant dense<0.000000e+00> : vector<64x128xf32>
    %91 = tpu.matmul %88, %90, %cst_45 {dimension_numbers = #tpu.dot_dimension_numbers<[1], [0], [0], [1], [0, 0, 1, 1], [], []>} : vector<64x32xf32>, vector<32x128xf32>, vector<64x128xf32> -> vector<64x128xf32>
    %cst_46 = arith.constant dense<0xFF800000> : vector<64xf32>
    %92 = vector.multi_reduction <maximumf>, %91, %cst_46 [1] : vector<64x128xf32> to vector<64xf32>
    %93 = vector.shape_cast %92 : vector<64xf32> to vector<64x1xf32>
    %94 = vector.broadcast %93 : vector<64x1xf32> to vector<64x128xf32>
    %95 = arith.subf %91, %94 : vector<64x128xf32>
    %96 = math.exp %95 : vector<64x128xf32>
    %cst_47 = arith.constant dense<0.000000e+00> : vector<64xf32>
    %97 = vector.multi_reduction <add>, %96, %cst_47 [1] : vector<64x128xf32> to vector<64xf32>
    %98 = vector.shape_cast %97 : vector<64xf32> to vector<64x1xf32>
    %99 = tpu.reciprocal %98 {approx = true} : vector<64x1xf32> -> vector<64x1xf32>
    %100 = arith.mulf %98, %99 : vector<64x1xf32>
    %cst_48 = arith.constant 2.000000e+00 : f32
    %101 = vector.broadcast %cst_48 : f32 to vector<64x1xf32>
    %102 = arith.subf %101, %100 : vector<64x1xf32>
    %103 = arith.mulf %99, %102 : vector<64x1xf32>
    %104 = vector.broadcast %103 : vector<64x1xf32> to vector<64x128xf32>
    %105 = arith.mulf %96, %104 : vector<64x128xf32>
    %c3_49 = arith.constant 3 : index
    %c0_50 = arith.constant 0 : index
    %c0_51 = arith.constant 0 : index
    %106 = vector.load %arg5[%c3_49, %c0_50, %c0_51] : memref<4x128x32xf32, #tpu.memory_space<vmem>>, vector<1x128x32xf32>
    %107 = vector.shape_cast %106 : vector<1x128x32xf32> to vector<128x32xf32>
    %cst_52 = arith.constant dense<0.000000e+00> : vector<64x32xf32>
    %108 = tpu.matmul %105, %107, %cst_52 {dimension_numbers = #tpu.dot_dimension_numbers<[1], [0], [0], [1], [0, 0, 1, 1], [], []>} : vector<64x128xf32>, vector<128x32xf32>, vector<64x32xf32> -> vector<64x32xf32>
    %c0_53 = arith.constant 0 : index
    %c0_54 = arith.constant 0 : index
    %c96 = arith.constant 96 : index
    %109 = vector.load %arg3[%c0_53, %c0_54, %c96] : memref<1x64x128xf32, #tpu.memory_space<vmem>>, vector<1x64x32xf32>
    %110 = vector.shape_cast %109 : vector<1x64x32xf32> to vector<64x32xf32>
    %111 = vector.shape_cast %108 : vector<64x32xf32> to vector<1x64x32xf32>
    tpu.vector_store %arg3[%c0_53, %c0_54, %c96], %111 {strides = array<i32>} : memref<1x64x128xf32, #tpu.memory_space<vmem>>, vector<1x64x32xf32>,
    return
  }
  func.func @transform_0(%arg0: i32, %arg1: i32) -> (i32, i32, i32) {
    %c0_i32 = arith.constant 0 : i32
    %c0_i32_0 = arith.constant 0 : i32
    %c0_i32_1 = arith.constant 0 : i32
    return %arg0, %c0_i32, %c0_i32_0 : i32, i32, i32
  }
  func.func @transform_1(%arg0: i32, %arg1: i32) -> (i32, i32, i32) {
    %c0_i32 = arith.constant 0 : i32
    %c0_i32_0 = arith.constant 0 : i32
    return %arg0, %arg1, %c0_i32 : i32, i32, i32
  }
}

</mosaic_0001>

<bundles_post_ra>
// kernel: tpu_custom_call.1
= control target key start
LH: loop header
LB: loop body
LE: loop exit
PB: predicated region body
PF: predicated region fallthrough
CT: control target
= control target key end

     0   :  { %6 = vsyncpa [#allocation5], 0  ;;  %s4681_s0 = inlined_call_operand.hbm [shape: f32[2,128,384], index: 0, kind: input, shape index: {}]   ;;  %s4682_s1 = inlined_call_operand.hbm [shape: f32[2,128,128], index: 1, kind: output, shape index: {}]  }
   0x1   :  { %8 = vsyncpa [#allocation5 + $0x1], 0 }
   0x2   :  { %9 = vsyncpa [#allocation6], 0 }
   0x3   :  { %11 = vsyncpa [#allocation6 + $0x1], 0  ;;  %s3566_s6 = smov 0   ;;  %s3568_s7 = smov 0  }
   0x4   :  { %s3570_s8 = smov 0   ;;  %s3572_s9 = smov 0  }
   0x5   :  { %s3574_s10 = smov 0   ;;  %s3576_s11 = smov 0  }
   0x6   :  { %s3578_s12 = smov 0   ;;  %s3580_s13 = smov 0  }
   0x7   :  { %s3582_s14 = smov 0   ;;  %s3584_s15 = smov 0  }
   0x8   :  { %s3586_s16 = smov 0  }
   0x9 LB: > { %s2538_s17 = sadd.s32 4294967295, %s3542_s16   ;;  %s2539_s18 = sadd.s32 4294967294, %s3542_s16   ;;  %s3542_s16 = sphi %s3586_s16, %s17_s16   ;;  %s3538_s15 = sphi %s3584_s15, %s4701_s15   ;;  %s3534_s14 = sphi %s3582_s14, %s4700_s14   ;;  %s3530_s13 = sphi %s3580_s13, %s4699_s13   ;;  %s3526_s12 = sphi %s3578_s12, %s4698_s12   ;;  %s3522_s11 = sphi %s3576_s11, %s4697_s11   ;;  %s3518_s10 = sphi %s3574_s10, %s4696_s10   ;;  %s3514_s9 = sphi %s3572_s9, %s4695_s9   ;;  %s3510_s8 = sphi %s3570_s8, %s4694_s8   ;;  %s3506_s7 = sphi %s3568_s7, %s4693_s7   ;;  %s3502_s6 = sphi %s3566_s6, %s4692_s6  }
   0xa   : > { %s26_s19 = sadd.s32 1, %s3534_s14  ;;  %s29_s20 = sadd.s32 1, %s3538_s15 }
   0xb   : > { %p27_p0 = scmp.ge.s32.totalorder %s26_s19, 2  ;;  %s36_s21 = sadd.s32 1, %s3522_s11 }
   0xc   : > { %p43_p1 = scmp.ne.s32.totalorder %s3522_s11, %s3518_s10  ;;  %p44_p2 = scmp.eq.s32.totalorder %s3542_s16, 0 }
   0xd   : > { %s4703_s19 = smov (%p27_p0, %s26_s19), 0  ;;  %s4705_s20 = smov (!%p27_p0, %s29_s20), %s3538_s15 }
   0xe   : > { %p3630_p3 = por %p44_p2, %p43_p1  ;;  %p49_p4 = scmp.ne.s32.totalorder %s3518_s10, %s3514_s9 }
   0xf   : > { %p31_p5 = scmp.ge.s32.totalorder %s4705_s20, 2  ;;  %p50_p6 = scmp.eq.s32.totalorder %s2538_s17, 0 }
  0x10   : > { %s60_s23 = ssub.s32 %s3534_s14, %s4703_s19  ;;  %s64_s24 = sadd.s32 1, %s3510_s8 }
  0x11   : > { %s4707_s20 = smov (%p31_p5, %s4705_s20), 0  ;;  %p3640_p7 = por %p50_p6, %p49_p4 }
  0x12   : > { %p74_p8 = scmp.ne.s32.totalorder %s3510_s8, %s3506_s7  ;;  %s33_s26 = ssub.s32 %s3538_s15, %s4707_s20 }
  0x13   : > { %p75_p9 = scmp.eq.s32.totalorder %s2538_s17, 3  ;;  %p34_p10 = scmp.eq.s32.totalorder %s33_s26, 0 }
  0x14   : > { %s61_s27 = sor.u32 %s60_s23, %s33_s26  ;;  %p80_p13 = scmp.ne.s32.totalorder %s3506_s7, %s3502_s6 }
  0x15   : > { %p62_p11 = scmp.eq.s32.totalorder %s61_s27, 0  ;;  %p3648_p12 = por %p75_p9, %p74_p8 }
  0x16   : > { %s3653_s29 = scalar_select %p34_p10, %s3522_s11, %s36_s21  }
  0x17   : > { %s4686_s28 = scalar_select %p3648_p12, 1, 0 }
  0x18   : > { %s3656_s30 = scalar_select %p62_p11, %s3510_s8, %s64_s24  }
  0x19   : > { %p81_p0 = scmp.eq.s32.totalorder %s2539_s18, 3  ;;  %p3162_p1 = scmp.lt.s32.totalorder %s3542_s16, 4 }
  0x1a   : > { %s101_s3 = sand.u32 1, %s3522_s11   ;;  %s3148_s5 = smul.u32 6144, %s3538_s15 }
  0x1b   : > { %p3661_p2 = por %p81_p0, %p80_p13  ;;  %s3147_s4 = smul.u32 384, %s101_s3 }
  0x1c   : > { %p3669_p4 = pnand %p3162_p1, %p3630_p3  ;;  %s3676_s23 = scalar_lea.hbm %s4681_s0, %s3148_s5 }
  0x1d   : > { %s4687_s2 = scalar_select %p3661_p2, 1, 0 }
  0x1e   : > { %s105_s18 = scalar_lea.vmem [#allocation4], %s3147_s4  ;;  %s3681_s22 = scalar_lea.sflag [#allocation5], %s101_s3 }
  0x1f   : > { %s112_s24 = sshll.u32 %s105_s18, 4  ;;  %s3390_s26 = scalar_lea.hbm %s3676_s23, 6144  ;;  %s3678_s24 = int_to_ptr.vmem [resolvable:$true] %s112_s24 }
  0x20   : > { %p3391_p3 = scmp.ne.s32.totalorder %s3676_s23, %s3390_s26  ;;  %p3392_p6 = pneg %p3669_p4 }
  0x21   : > { %s3395_s17 = scalar_lea.hbm %s4681_s0, 12288  ;;  %p3396_p10 = scmp.lt.u32.totalorder %s3676_s23, %s4681_s0 }
  0x22   : > { %p3393_p8 = pnand %p3392_p6, %p3391_p3  ;;  %p3397_p11 = scmp.lt.u32.totalorder %s3395_s17, %s3390_s26 }
  0x23   : > { %p3399_p0 = scmp.lt.u32.totalorder %s3390_s26, %s3676_s23 }
  0x24   : > { %p3394_p9 = pneg %p3393_p8  ;;  %p3398_p13 = por %p3397_p11, %p3396_p10 }
  0x26   : > { %p3400_p1 = por %p3399_p0, %p3398_p13 }
  0x28   : > { %p3401_p5 = pnand %p3400_p1, %p3394_p9 }
  0x2a   : > { %3404 = shalt.err (!%p3401_p5)
}
  0x2b   : > { %s3405_s3 = scalar_lea.vmem %s3678_s24, 6144  ;;  %s3544_s18 = smov [#allocation4]  }
  0x2c   : > { %p3406_p3 = scmp.ne.s32.totalorder %s3678_s24, %s3405_s3  ;;  %s3410_s27 = sshll.u32 %s3544_s18, 4  ;;  %s3411_s27 = int_to_ptr.vmem [resolvable:$false] %s3410_s27 }
  0x2d   : > { %s3412_s5 = scalar_lea.vmem %s3411_s27, 12288  ;;  %p3413_p12 = scmp.lt.s32.totalorder %s3678_s24, %s3411_s27 }
  0x2e   : > { %p3408_p8 = pnand %p3406_p3, %p3392_p6  ;;  %p3414_p10 = scmp.lt.s32.totalorder %s3412_s5, %s3405_s3 }
  0x30   : > { %p3409_p2 = pneg %p3408_p8  ;;  %p3415_p11 = por %p3414_p10, %p3413_p12 }
  0x32   : > { %p3416_p13 = pnand %p3415_p11, %p3409_p2 }
  0x34   : > { %3419 = shalt.err (!%p3416_p13)
}
  0x35   : > { %s3545_s26 = smov 384   ;;  %s3546_s17 = smov 24  }
  0x36   : > { %3157 = dma.hbm_to_vmem [thread:$0]  (!%p3669_p4), %s3676_s23, 6144, %s3678_s24, %s3681_s22, %s3545_s26, %s3545_s26, %s3546_s17  }
  0x37   : > { %p120_p5 = scmp.lt.s32.totalorder %s3542_s16, 5  ;;  %p4689_p6 = scmp.ge.s32.totalorder %s3542_s16, 1 }
  0x39   : > { %p121_p9 = pnand %p4689_p6, %p120_p5 }
  0x3a   : > { %s126_s21 = sand.u32 (!%p121_p9), 1, %s3518_s10  }
  0x3b   : > { %124 = sbr.rel (%p121_p9) target bundleno = 2193 (0x891), region = 24  ;;  %s127_s3 = scalar_lea.sflag (!%p121_p9), [#allocation5], %s126_s21 }
  0x3c   : > { %s3149_s4 = smul.u32 (!%p121_p9), 384, %s126_s21 }
  0x3e   : > { %s3713_s18 = scalar_lea.vmem (!%p121_p9), [#allocation4], %s3149_s4 }
  0x42   : > { %3493 = dma.done.wait (%p3640_p7), %s127_s3, 6144  }
  0x43   : > { %3495 = vsyncadd (%p3640_p7), %s127_s3, 4294961152  ;;  %s146_s9 = sand.u32 1, %s3506_s7   ;;  %p2545_p12 = scmp.ne.s32.totalorder %s3526_s12, 0 }
  0x44   : > { %s2544_s23 = sshll.u32 %s146_s9, 6  ;;  %v156_v0 = vld [vmem:[%s3713_s18 + $0x30] sm:$0xff] (!%p2545_p12)  ;;  %v154_v1 = vld [vmem:[%s3713_s18] sm:$0xff] (!%p2545_p12)  ;;  %s3547_s25 = smov (!%p2545_p12), 96   ;;  %v157_v2 = vld [vmem:[%s3713_s18 + $0x48] sm:$0xff] (!%p2545_p12)  ;;  %vm318_vm0 = vcmask (!%p2545_p12), 261120  }
  0x45   : > { %s3722_s24 = scalar_lea.vmem [#allocation7], %s2544_s23  ;;  %153 = sbr.rel (%p2545_p12) target bundleno = 568 (0x238), region = 32  ;;  %190 = vrot.lane.b32.xlu1 (!%p2545_p12), %v156_v0, %s3547_s25  ;;  %186 = vrot.lane.b32.xlu0 (!%p2545_p12), %v154_v1, %s3547_s25  ;;  %v155_v3 = vld [vmem:[%s3713_s18 + $0x18] sm:$0xff] (!%p2545_p12)  ;;  %v158_v5 = vld [vmem:[%s3713_s18 + $0x60] sm:$0xff] (!%p2545_p12) }
  0x46   : > { %v3734_v4 = vld [vmem:[%s3713_s18 + $0x78] sm:$0xff] (!%p2545_p12)  ;;  %v3741_v6 = vld [vmem:[%s3713_s18 + $0xa8] sm:$0xff] (!%p2545_p12)  ;;  %v3744_v7 = vld [vmem:[%s3713_s18 + $0x90] sm:$0xff] (!%p2545_p12)  ;;  %s3548_s22 = smov (!%p2545_p12), 64   ;;  %s3549_s27 = smov (!%p2545_p12), 32  }
  0x47   : > { %v3751_v8 = vld [vmem:[%s3713_s18 + $0xd8] sm:$0xff] (!%p2545_p12)  ;;  %v3754_v9 = vld [vmem:[%s3713_s18 + $0xc0] sm:$0xff] (!%p2545_p12)  ;;  %v3757_v10 = vld [vmem:[%s3713_s18 + $0x10] sm:$0xff] (!%p2545_p12) }
  0x48   : > { %v3760_v11 = vld [vmem:[%s3713_s18 + $0x28] sm:$0xff] (!%p2545_p12)  ;;  %v3763_v12 = vld [vmem:[%s3713_s18 + $0x40] sm:$0xff] (!%p2545_p12)  ;;  %v3770_v13 = vld [vmem:[%s3713_s18 + $0x58] sm:$0xff] (!%p2545_p12)  ;;  %603 = vst.msk [vmem:[#allocation3 + $0x100] sm:$0xff] (!%p2545_p12), %vm318_vm0, %v3757_v10 }
  0x49   : > { %192 = vrot.lane.b32.xlu1 (!%p2545_p12), %v157_v2, %s3547_s25  ;;  %188 = vrot.lane.b32.xlu0 (!%p2545_p12), %v155_v3, %s3547_s25  ;;  %v3773_v14 = vld [vmem:[%s3713_s18 + $0x70] sm:$0xff] (!%p2545_p12)  ;;  %v3776_v15 = vld [vmem:[%s3713_s18 + $0x108] sm:$0xff] (!%p2545_p12)  ;;  %604 = vst.msk [vmem:[#allocation3 + $0x108] sm:$0xff] (!%p2545_p12), %vm318_vm0, %v3760_v11  ;;  %605 = vst.msk [vmem:[#allocation3 + $0x110] sm:$0xff] (!%p2545_p12), %vm318_vm0, %v3763_v12 }
  0x4a   : > { %v3779_v16 = vld [vmem:[%s3713_s18 + $0xf0] sm:$0xff] (!%p2545_p12)  ;;  %606 = vst.msk [vmem:[#allocation3 + $0x118] sm:$0xff] (!%p2545_p12), %vm318_vm0, %v3770_v13  ;;  %607 = vst.msk [vmem:[#allocation3 + $0x120] sm:$0xff] (!%p2545_p12), %vm318_vm0, %v3773_v14  ;;  %v3792_v17 = vld [vmem:[%s3713_s18 + $0x88] sm:$0xff] (!%p2545_p12) }
  0x4b   : > { %608 = vst.msk [vmem:[#allocation3 + $0x128] sm:$0xff] (!%p2545_p12), %vm318_vm0, %v3792_v17  ;;  %v3801_v18 = vld [vmem:[%s3713_s18 + $0x138] sm:$0xff] (!%p2545_p12)  ;;  %v3804_v19 = vld [vmem:[%s3713_s18 + $0x120] sm:$0xff] (!%p2545_p12)  ;;  %v3816_v21 = vld [vmem:[%s3713_s18 + $0x168] sm:$0xff] (!%p2545_p12) }
  0x4c   : > { %v3807_v20 = vld [vmem:[%s3713_s18 + $0xa0] sm:$0xff]  ;;  %v3819_v22 = vld [vmem:[%s3713_s18 + $0x150] sm:$0xff]  ;;  %v3822_v23 = vld [vmem:[%s3713_s18 + $0xb8] sm:$0xff] }
  0x4d   : > { %196 = vrot.lane.b32.xlu1 %v3734_v4, %s3547_s25  ;;  %194 = vrot.lane.b32.xlu0 %v158_v5, %s3547_s25  ;;  %609 = vst.msk [vmem:[#allocation3 + $0x130] sm:$0xff] %vm318_vm0, %v3807_v20  ;;  %610 = vst.msk [vmem:[#allocation3 + $0x138] sm:$0xff] %vm318_vm0, %v3822_v23  ;;  %v3831_v24 = vld [vmem:[%s3713_s18 + $0x8] sm:$0xff]  ;;  %v3834_v25 = vld [vmem:[%s3713_s18 + $0xd0] sm:$0xff] }
  0x4e   : > { %611 = vst.msk [vmem:[#allocation3 + $0x140] sm:$0xff] %vm318_vm0, %v3834_v25  ;;  %v3842_v26 = vld [vmem:[%s3713_s18 + $0x20] sm:$0xff]  ;;  %v3845_v27 = vld [vmem:[%s3713_s18 + $0xe8] sm:$0xff]  ;;  %v3853_v28 = vld [vmem:[%s3713_s18 + $0x38] sm:$0xff] }
  0x4f   : > { %612 = vst.msk [vmem:[#allocation3 + $0x148] sm:$0xff] %vm318_vm0, %v3845_v27  ;;  %v3856_v29 = vld [vmem:[%s3713_s18 + $0x100] sm:$0xff]  ;;  %v3864_v30 = vld [vmem:[%s3713_s18 + $0x50] sm:$0xff]  ;;  %v3867_v31 = vld [vmem:[%s3713_s18 + $0x118] sm:$0xff] }
  0x50   : > { %613 = vst.msk [vmem:[#allocation3 + $0x150] sm:$0xff] %vm318_vm0, %v3856_v29  ;;  %614 = vst.msk [vmem:[#allocation3 + $0x158] sm:$0xff] %vm318_vm0, %v3867_v31  ;;  %v3875_v32 = vld [vmem:[%s3713_s18 + $0x68] sm:$0xff]  ;;  %v3878_v33 = vld [vmem:[%s3713_s18 + $0x130] sm:$0xff] }
  0x51   : > { %200 = vrot.lane.b32.xlu1 %v3741_v6, %s3547_s25  ;;  %198 = vrot.lane.b32.xlu0 %v3744_v7, %s3547_s25  ;;  %615 = vst.msk [vmem:[#allocation3 + $0x160] sm:$0xff] %vm318_vm0, %v3878_v33  ;;  %v3886_v34 = vld [vmem:[%s3713_s18 + $0x80] sm:$0xff]  ;;  %v3889_v35 = vld [vmem:[%s3713_s18 + $0x148] sm:$0xff] }
  0x52   : > { %616 = vst.msk [vmem:[#allocation3 + $0x168] sm:$0xff] %vm318_vm0, %v3889_v35  ;;  %v3898_v36 = vld [vmem:[%s3713_s18 + $0x98] sm:$0xff]  ;;  %v3901_v37 = vld [vmem:[%s3713_s18 + $0x160] sm:$0xff]  ;;  %v3910_v38 = vld [vmem:[%s3713_s18 + $0xb0] sm:$0xff] }
  0x53   : > { %617 = vst.msk [vmem:[#allocation3 + $0x170] sm:$0xff] %vm318_vm0, %v3901_v37  ;;  %v3913_v39 = vld [vmem:[%s3713_s18 + $0x178] sm:$0xff]  ;;  %v3922_v40 = vld [vmem:[%s3713_s18 + $0xc8] sm:$0xff]  ;;  %v3929_v41 = vld [vmem:[%s3713_s18 + $0xe0] sm:$0xff] }
  0x54   : > { %618 = vst.msk [vmem:[#allocation3 + $0x178] sm:$0xff] %vm318_vm0, %v3913_v39  ;;  %v3936_v42 = vld [vmem:[%s3713_s18 + $0x110] sm:$0xff]  ;;  %v3943_v43 = vld [vmem:[%s3713_s18 + $0x128] sm:$0xff]  ;;  %v3950_v44 = vld [vmem:[%s3713_s18 + $0x140] sm:$0xff] }
  0x55   : > { %204 = vrot.lane.b32.xlu1 %v3751_v8, %s3547_s25  ;;  %202 = vrot.lane.b32.xlu0 %v3754_v9, %s3547_s25  ;;  %v3957_v45 = vld [vmem:[%s3713_s18 + $0x158] sm:$0xff]  ;;  %v3964_v46 = vld [vmem:[%s3713_s18 + $0x170] sm:$0xff] }
  0x56   : > { %v3975_v47 = vld [vmem:[%s3713_s18 + $0xf8] sm:$0xff] }
  0x59   : > { %208 = vrot.lane.b32.xlu1 %v3776_v15, %s3547_s25  ;;  %206 = vrot.lane.b32.xlu0 %v3779_v16, %s3547_s25 }
  0x5d   : > { %212 = vrot.lane.b32.xlu1 %v3801_v18, %s3547_s25  ;;  %210 = vrot.lane.b32.xlu0 %v3804_v19, %s3547_s25 }
  0x61   : > { %216 = vrot.lane.b32.xlu1 %v3816_v21, %s3547_s25  ;;  %214 = vrot.lane.b32.xlu0 %v3819_v22, %s3547_s25 }
  0x65   : > { %270 = vrot.lane.b32.xlu1 %v154_v1, %s3548_s22  ;;  %404 = vrot.lane.b32.xlu0 %v3831_v24, %s3547_s25 }
  0x69   : > { %272 = vrot.lane.b32.xlu1 %v155_v3, %s3548_s22  ;;  %406 = vrot.lane.b32.xlu0 %v3842_v26, %s3547_s25 }
  0x6d   : > { %274 = vrot.lane.b32.xlu1 %v156_v0, %s3548_s22  ;;  %408 = vrot.lane.b32.xlu0 %v3853_v28, %s3547_s25 }
  0x71   : > { %276 = vrot.lane.b32.xlu1 %v157_v2, %s3548_s22  ;;  %410 = vrot.lane.b32.xlu0 %v3864_v30, %s3547_s25 }
  0x75   : > { %278 = vrot.lane.b32.xlu1 %v158_v5, %s3548_s22  ;;  %412 = vrot.lane.b32.xlu0 %v3875_v32, %s3547_s25 }
  0x79   : > { %280 = vrot.lane.b32.xlu1 %v3734_v4, %s3548_s22  ;;  %414 = vrot.lane.b32.xlu0 %v3886_v34, %s3547_s25 }
  0x7d   : > { %282 = vrot.lane.b32.xlu1 %v3744_v7, %s3548_s22  ;;  %416 = vrot.lane.b32.xlu0 %v3898_v36, %s3547_s25 }
  0x81   : > { %284 = vrot.lane.b32.xlu1 %v3741_v6, %s3548_s22  ;;  %418 = vrot.lane.b32.xlu0 %v3910_v38, %s3547_s25 }
  0x85   : > { %286 = vrot.lane.b32.xlu1 %v3754_v9, %s3548_s22  ;;  %420 = vrot.lane.b32.xlu0 %v3922_v40, %s3547_s25 }
  0x89   : > { %288 = vrot.lane.b32.xlu1 %v3751_v8, %s3548_s22  ;;  %422 = vrot.lane.b32.xlu0 %v3929_v41, %s3547_s25 }
  0x8d   : > { %290 = vrot.lane.b32.xlu1 %v3779_v16, %s3548_s22  ;;  %426 = vrot.lane.b32.xlu0 %v3936_v42, %s3547_s25 }
  0x91   : > { %292 = vrot.lane.b32.xlu1 %v3776_v15, %s3548_s22  ;;  %428 = vrot.lane.b32.xlu0 %v3943_v43, %s3547_s25 }
  0x95   : > { %294 = vrot.lane.b32.xlu1 %v3804_v19, %s3548_s22  ;;  %430 = vrot.lane.b32.xlu0 %v3950_v44, %s3547_s25 }
  0x99   : > { %296 = vrot.lane.b32.xlu1 %v3801_v18, %s3548_s22  ;;  %432 = vrot.lane.b32.xlu0 %v3957_v45, %s3547_s25 }
  0x9d   : > { %298 = vrot.lane.b32.xlu1 %v3819_v22, %s3548_s22  ;;  %434 = vrot.lane.b32.xlu0 %v3964_v46, %s3547_s25 }
  0xa1   : > { %300 = vrot.lane.b32.xlu1 %v3816_v21, %s3548_s22  ;;  %517 = vrot.lane.b32.xlu0 %v3831_v24, %s3549_s27 }
  0xa5   : > { %424 = vrot.lane.b32.xlu1 %v3975_v47, %s3547_s25  ;;  %519 = vrot.lane.b32.xlu0 %v3842_v26, %s3549_s27 }
  0xa9   : > { %523 = vrot.lane.b32.xlu1 %v3864_v30, %s3549_s27  ;;  %521 = vrot.lane.b32.xlu0 %v3853_v28, %s3549_s27 }
  0xad   : > { %527 = vrot.lane.b32.xlu1 %v3886_v34, %s3549_s27  ;;  %525 = vrot.lane.b32.xlu0 %v3875_v32, %s3549_s27 }
  0xb1   : > { %531 = vrot.lane.b32.xlu1 %v3910_v38, %s3549_s27  ;;  %529 = vrot.lane.b32.xlu0 %v3898_v36, %s3549_s27 }
  0xb5   : > { %535 = vrot.lane.b32.xlu1 %v3929_v41, %s3549_s27  ;;  %533 = vrot.lane.b32.xlu0 %v3922_v40, %s3549_s27 }
  0xb7   : > { %v191_v48 = vpop.permute.xlu1 %190  ;;  %v187_v49 = vpop.permute.xlu0 %186 }
  0xb9   : > { %539 = vrot.lane.b32.xlu1 %v3936_v42, %s3549_s27  ;;  %537 = vrot.lane.b32.xlu0 %v3975_v47, %s3549_s27 }
  0xbb   : > { %v193_v50 = vpop.permute.xlu1 %192  ;;  %v189_v51 = vpop.permute.xlu0 %188 }
  0xbd   : > { %543 = vrot.lane.b32.xlu1 %v3950_v44, %s3549_s27  ;;  %541 = vrot.lane.b32.xlu0 %v3943_v43, %s3549_s27 }
  0xbf   : > { %v197_v52 = vpop.permute.xlu1 %196  ;;  %v195_v53 = vpop.permute.xlu0 %194 }
  0xc1   : > { %547 = vrot.lane.b32.xlu1 %v3964_v46, %s3549_s27  ;;  %545 = vrot.lane.b32.xlu0 %v3957_v45, %s3549_s27 }
  0xc3   : > { %v4009_v54 = vpop.permute.xlu1 %200  ;;  %v199_v55 = vpop.permute.xlu0 %198 }
  0xc5   : > { %651 = vrot.lane.b32.xlu1 %v3757_v10, %s3548_s22 }
  0xc7   : > { %v4013_v56 = vpop.permute.xlu1 %204  ;;  %v4015_v57 = vpop.permute.xlu0 %202 }
  0xc9   : > { %653 = vrot.lane.b32.xlu1 %v3760_v11, %s3548_s22 }
  0xcb   : > { %v4019_v58 = vpop.permute.xlu1 %208  ;;  %v4021_v59 = vpop.permute.xlu0 %206 }
  0xcd   : > { %655 = vrot.lane.b32.xlu1 %v3763_v12, %s3548_s22 }
  0xcf   : > { %v4025_v60 = vpop.permute.xlu1 %212  ;;  %v4027_v61 = vpop.permute.xlu0 %210 }
  0xd1   : > { %657 = vrot.lane.b32.xlu1 %v3770_v13, %s3548_s22 }
  0xd3   : > { %v4031_v62 = vpop.permute.xlu1 %216  ;;  %v4033_v63 = vpop.permute.xlu0 %214 }
  0xd5   : > { %659 = vrot.lane.b32.xlu1 %v3773_v14, %s3548_s22 }
  0xd7   : > { %v271_v0 = vpop.permute.xlu1 %270  ;;  %v405_v1 = vpop.permute.xlu0 %404 }
  0xd8   : > { %319 = vst.msk [vmem:[#allocation3] sm:$0xff] %vm318_vm0, %v271_v0  ;;  %453 = vst.msk [vmem:[#allocation3 + $0x80] sm:$0xff] %vm318_vm0, %v405_v1 }
  0xd9   : > { %661 = vrot.lane.b32.xlu1 %v3792_v17, %s3548_s22 }
  0xdb   : > { %v273_v2 = vpop.permute.xlu1 %272  ;;  %v407_v3 = vpop.permute.xlu0 %406 }
  0xdc   : > { %320 = vst.msk [vmem:[#allocation3 + $0x8] sm:$0xff] %vm318_vm0, %v273_v2  ;;  %454 = vst.msk [vmem:[#allocation3 + $0x88] sm:$0xff] %vm318_vm0, %v407_v3 }
  0xdd   : > { %663 = vrot.lane.b32.xlu1 %v3807_v20, %s3548_s22 }
  0xdf   : > { %v275_v4 = vpop.permute.xlu1 %274  ;;  %234 = vxpose.xlu0.b32.start [1/16] (narrow) %v187_v49, 32  ;;  %v409_v5 = vpop.permute.xlu0 %408 }
  0xe0   : > { %321 = vst.msk [vmem:[#allocation3 + $0x10] sm:$0xff] %vm318_vm0, %v275_v4  ;;  %455 = vst.msk [vmem:[#allocation3 + $0x90] sm:$0xff] %vm318_vm0, %v409_v5 }
  0xe1   : > { %665 = vrot.lane.b32.xlu1 %v3822_v23, %s3548_s22 }
  0xe3   : > { %v277_v6 = vpop.permute.xlu1 %276  ;;  %235 = vxpose.xlu0.b32.cont [2/16] (narrow) %v189_v51, 32  ;;  %v411_v7 = vpop.permute.xlu0 %410 }
  0xe4   : > { %322 = vst.msk [vmem:[#allocation3 + $0x18] sm:$0xff] %vm318_vm0, %v277_v6  ;;  %456 = vst.msk [vmem:[#allocation3 + $0x98] sm:$0xff] %vm318_vm0, %v411_v7 }
  0xe5   : > { %667 = vrot.lane.b32.xlu1 %v3834_v25, %s3548_s22 }
  0xe7   : > { %v279_v8 = vpop.permute.xlu1 %278  ;;  %236 = vxpose.xlu0.b32.cont [3/16] (narrow) %v191_v48, 32  ;;  %v413_v9 = vpop.permute.xlu0 %412 }
  0xe8   : > { %323 = vst.msk [vmem:[#allocation3 + $0x20] sm:$0xff] %vm318_vm0, %v279_v8  ;;  %457 = vst.msk [vmem:[#allocation3 + $0xa0] sm:$0xff] %vm318_vm0, %v413_v9 }
  0xe9   : > { %669 = vrot.lane.b32.xlu1 %v3845_v27, %s3548_s22 }
  0xeb   : > { %v281_v15 = vpop.permute.xlu1 %280  ;;  %237 = vxpose.xlu0.b32.cont [4/16] (narrow) %v193_v50, 32  ;;  %v415_v16 = vpop.permute.xlu0 %414 }
  0xec   : > { %324 = vst.msk [vmem:[#allocation3 + $0x28] sm:$0xff] %vm318_vm0, %v281_v15  ;;  %458 = vst.msk [vmem:[#allocation3 + $0xa8] sm:$0xff] %vm318_vm0, %v415_v16 }
  0xed   : > { %671 = vrot.lane.b32.xlu1 %v3856_v29, %s3548_s22 }
  0xef   : > { %v283_v18 = vpop.permute.xlu1 %282  ;;  %238 = vxpose.xlu0.b32.cont [5/16] (narrow) %v195_v53, 32  ;;  %v417_v19 = vpop.permute.xlu0 %416 }
  0xf0   : > { %325 = vst.msk [vmem:[#allocation3 + $0x30] sm:$0xff] %vm318_vm0, %v283_v18  ;;  %459 = vst.msk [vmem:[#allocation3 + $0xb0] sm:$0xff] %vm318_vm0, %v417_v19 }
  0xf1   : > { %673 = vrot.lane.b32.xlu1 %v3867_v31, %s3548_s22 }
  0xf3   : > { %v285_v21 = vpop.permute.xlu1 %284  ;;  %239 = vxpose.xlu0.b32.cont [6/16] (narrow) %v197_v52, 32  ;;  %v419_v22 = vpop.permute.xlu0 %418 }
  0xf4   : > { %326 = vst.msk [vmem:[#allocation3 + $0x38] sm:$0xff] %vm318_vm0, %v285_v21  ;;  %460 = vst.msk [vmem:[#allocation3 + $0xb8] sm:$0xff] %vm318_vm0, %v419_v22 }
  0xf5   : > { %675 = vrot.lane.b32.xlu1 %v3878_v33, %s3548_s22 }
  0xf7   : > { %v287_v48 = vpop.permute.xlu1 %286  ;;  %240 = vxpose.xlu0.b32.cont [7/16] (narrow) %v199_v55, 32  ;;  %v421_v49 = vpop.permute.xlu0 %420 }
  0xf8   : > { %327 = vst.msk [vmem:[#allocation3 + $0x40] sm:$0xff] %vm318_vm0, %v287_v48  ;;  %461 = vst.msk [vmem:[#allocation3 + $0xc0] sm:$0xff] %vm318_vm0, %v421_v49 }
  0xf9   : > { %677 = vrot.lane.b32.xlu1 %v3889_v35, %s3548_s22 }
  0xfb   : > { %v289_v50 = vpop.permute.xlu1 %288  ;;  %241 = vxpose.xlu0.b32.cont [8/16] (narrow) %v4009_v54, 32  ;;  %v423_v51 = vpop.permute.xlu0 %422 }
  0xfc   : > { %328 = vst.msk [vmem:[#allocation3 + $0x48] sm:$0xff] %vm318_vm0, %v289_v50  ;;  %462 = vst.msk [vmem:[#allocation3 + $0xc8] sm:$0xff] %vm318_vm0, %v423_v51 }
  0xfd   : > { %679 = vrot.lane.b32.xlu1 %v3901_v37, %s3548_s22 }
  0xff   : > { %v291_v52 = vpop.permute.xlu1 %290  ;;  %242 = vxpose.xlu0.b32.cont [9/16] (narrow) %v4015_v57, 32  ;;  %v427_v53 = vpop.permute.xlu0 %426 }
 0x100   : > { %329 = vst.msk [vmem:[#allocation3 + $0x50] sm:$0xff] %vm318_vm0, %v291_v52  ;;  %464 = vst.msk [vmem:[#allocation3 + $0xd8] sm:$0xff] %vm318_vm0, %v427_v53 }
 0x101   : > { %681 = vrot.lane.b32.xlu1 %v3913_v39, %s3548_s22 }
 0x103   : > { %v293_v54 = vpop.permute.xlu1 %292  ;;  %243 = vxpose.xlu0.b32.cont [10/16] (narrow) %v4013_v56, 32  ;;  %v429_v55 = vpop.permute.xlu0 %428 }
 0x104   : > { %330 = vst.msk [vmem:[#allocation3 + $0x58] sm:$0xff] %vm318_vm0, %v293_v54  ;;  %465 = vst.msk [vmem:[#allocation3 + $0xe0] sm:$0xff] %vm318_vm0, %v429_v55 }
 0x107   : > { %v295_v0 = vpop.permute.xlu1 %294  ;;  %244 = vxpose.xlu0.b32.cont [11/16] (narrow) %v4021_v59, 32  ;;  %v431_v57 = vpop.permute.xlu0 %430 }
 0x108   : > { %331 = vst.msk [vmem:[#allocation3 + $0x60] sm:$0xff] %vm318_vm0, %v295_v0  ;;  %466 = vst.msk [vmem:[#allocation3 + $0xe8] sm:$0xff] %vm318_vm0, %v431_v57 }
 0x10b   : > { %v297_v1 = vpop.permute.xlu1 %296  ;;  %245 = vxpose.xlu0.b32.cont [12/16] (narrow) %v4019_v58, 32  ;;  %v433_v2 = vpop.permute.xlu0 %432 }
 0x10c   : > { %332 = vst.msk [vmem:[#allocation3 + $0x68] sm:$0xff] %vm318_vm0, %v297_v1  ;;  %467 = vst.msk [vmem:[#allocation3 + $0xf0] sm:$0xff] %vm318_vm0, %v433_v2 }
 0x10f   : > { %v299_v56 = vpop.permute.xlu1 %298  ;;  %246 = vxpose.xlu0.b32.cont [13/16] (narrow) %v4027_v61, 32  ;;  %v435_v3 = vpop.permute.xlu0 %434 }
 0x110   : > { %333 = vst.msk [vmem:[#allocation3 + $0x70] sm:$0xff] %vm318_vm0, %v299_v56  ;;  %468 = vst.msk [vmem:[#allocation3 + $0xf8] sm:$0xff] %vm318_vm0, %v435_v3 }
 0x113   : > { %v301_v59 = vpop.permute.xlu1 %300  ;;  %247 = vxpose.xlu0.b32.cont [14/16] (narrow) %v4025_v60, 32  ;;  %v518_v58 = vpop.permute.xlu0 %517 }
 0x114   : > { %334 = vst.msk [vmem:[#allocation3 + $0x78] sm:$0xff] %vm318_vm0, %v301_v59 }
 0x117   : > { %v425_v4 = vpop.permute.xlu1 %424  ;;  %248 = vxpose.xlu0.b32.cont [15/16] (narrow) %v4033_v63, 32  ;;  %v520_v61 = vpop.permute.xlu0 %519 }
 0x118   : > { %463 = vst.msk [vmem:[#allocation3 + $0xd0] sm:$0xff] %vm318_vm0, %v425_v4 }
 0x11b   : > { %249 = vxpose.xlu0.b32.end [16/16] (narrow) %v4031_v62, 32  ;;  %v524_v5 = vpop.permute.xlu1 %523  ;;  %v522_v6 = vpop.permute.xlu0 %521 }
 0x11f   : > { %565 = vxpose.xlu0.b32.start [1/16] (narrow) %v518_v58, 32  ;;  %v528_v7 = vpop.permute.xlu1 %527  ;;  %v526_v8 = vpop.permute.xlu0 %525 }
 0x123   : > { %566 = vxpose.xlu0.b32.cont [2/16] (narrow) %v520_v61, 32  ;;  %v532_v60 = vpop.permute.xlu1 %531  ;;  %v530_v62 = vpop.permute.xlu0 %529 }
 0x127   : > { %567 = vxpose.xlu0.b32.cont [3/16] (narrow) %v522_v6, 32  ;;  %v536_v63 = vpop.permute.xlu1 %535  ;;  %v534_v15 = vpop.permute.xlu0 %533 }
 0x12a   : > { %351 = vxpose.xlu1.b32.start [1/16] (narrow) %v3831_v24, 32 }
 0x12b   : > { %568 = vxpose.xlu0.b32.cont [4/16] (narrow) %v524_v5, 32  ;;  %v540_v9 = vpop.permute.xlu1 %539 }
 0x12e   : > { %352 = vxpose.xlu1.b32.cont [2/16] (narrow) %v3842_v26, 32 }
 0x12f   : > { %569 = vxpose.xlu0.b32.cont [5/16] (narrow) %v526_v8, 32  ;;  %v544_v24 = vpop.permute.xlu1 %543 }
 0x132   : > { %353 = vxpose.xlu1.b32.cont [3/16] (narrow) %v3853_v28, 32  ;;  %v538_v28 = vpop.permute.xlu0 %537 }
 0x133   : > { %570 = vxpose.xlu0.b32.cont [6/16] (narrow) %v528_v7, 32  ;;  %v548_v26 = vpop.permute.xlu1 %547 }
 0x136   : > { %354 = vxpose.xlu1.b32.cont [4/16] (narrow) %v3864_v30, 32  ;;  %v542_v16 = vpop.permute.xlu0 %541 }
 0x137   : > { %571 = vxpose.xlu0.b32.cont [7/16] (narrow) %v530_v62, 32  ;;  %v652_v30 = vpop.permute.xlu1 %651 }
 0x13a   : > { %355 = vxpose.xlu1.b32.cont [5/16] (narrow) %v3875_v32, 32 }
 0x13b   : > { %572 = vxpose.xlu0.b32.cont [8/16] (narrow) %v532_v60, 32  ;;  %v654_v32 = vpop.permute.xlu1 %653 }
 0x13e   : > { %356 = vxpose.xlu1.b32.cont [6/16] (narrow) %v3886_v34, 32  ;;  %v546_v34 = vpop.permute.xlu0 %545 }
 0x13f   : > { %573 = vxpose.xlu0.b32.cont [9/16] (narrow) %v534_v15, 32 }
 0x142   : > { %357 = vxpose.xlu1.b32.cont [7/16] (narrow) %v3898_v36, 32  ;;  %v656_v36 = vpop.permute.xlu1 %655 }
 0x143   : > { %574 = vxpose.xlu0.b32.cont [10/16] (narrow) %v536_v63, 32 }
 0x146   : > { %358 = vxpose.xlu1.b32.cont [8/16] (narrow) %v3910_v38, 32  ;;  %v658_v38 = vpop.permute.xlu1 %657 }
 0x147   : > { %575 = vxpose.xlu0.b32.cont [11/16] (narrow) %v538_v28, 32 }
 0x14a   : > { %359 = vxpose.xlu1.b32.cont [9/16] (narrow) %v3922_v40, 32 }
 0x14b   : > { %576 = vxpose.xlu0.b32.cont [12/16] (narrow) %v540_v9, 32 }
 0x14e   : > { %360 = vxpose.xlu1.b32.cont [10/16] (narrow) %v3929_v41, 32  ;;  %v660_v41 = vpop.permute.xlu1 %659 }
 0x14f   : > { %577 = vxpose.xlu0.b32.cont [13/16] (narrow) %v542_v16, 32 }
 0x152   : > { %361 = vxpose.xlu1.b32.cont [11/16] (narrow) %v3975_v47, 32 }
 0x153   : > { %578 = vxpose.xlu0.b32.cont [14/16] (narrow) %v544_v24, 32 }
 0x156   : > { %362 = vxpose.xlu1.b32.cont [12/16] (narrow) %v3936_v42, 32  ;;  %v662_v42 = vpop.permute.xlu1 %661 }
 0x157   : > { %579 = vxpose.xlu0.b32.cont [15/16] (narrow) %v546_v34, 32 }
 0x15a   : > { %363 = vxpose.xlu1.b32.cont [13/16] (narrow) %v3943_v43, 32  ;;  %v664_v43 = vpop.permute.xlu1 %663 }
 0x15b   : > { %580 = vxpose.xlu0.b32.end [16/16] (narrow) %v548_v26, 32 }
 0x15e   : > { %364 = vxpose.xlu1.b32.cont [14/16] (narrow) %v3950_v44, 32  ;;  %v666_v21 = vpop.permute.xlu1 %665 }
 0x15f   : > { %v250_v40 = vpop.trf.xlu0 }
 0x160   : > { %266 = vst [vmem:[#allocation2] sm:$0xff] %v250_v40 }
 0x162   : > { %365 = vxpose.xlu1.b32.cont [15/16] (narrow) %v3957_v45, 32  ;;  %v668_v44 = vpop.permute.xlu1 %667 }
 0x163   : > { %v251_v18 = vpop.trf.xlu0 }
 0x164   : > { %267 = vst [vmem:[#allocation2 + $0x8] sm:$0xff] %v251_v18 }
 0x166   : > { %366 = vxpose.xlu1.b32.end [16/16] (narrow) %v3964_v46, 32  ;;  %v670_v45 = vpop.permute.xlu1 %669 }
 0x167   : > { %v252_v47 = vpop.trf.xlu0 }
 0x168   : > { %268 = vst [vmem:[#allocation2 + $0x10] sm:$0xff] %v252_v47 }
 0x16a   : > { %699 = vxpose.xlu1.b32.start [1/16] (narrow) %v652_v30, 32  ;;  %v672_v46 = vpop.permute.xlu1 %671 }
 0x16b   : > { %v253_v19 = vpop.trf.xlu0 }
 0x16c   : > { %269 = vst [vmem:[#allocation2 + $0x18] sm:$0xff] %v253_v19 }
 0x16e   : > { %700 = vxpose.xlu1.b32.cont [2/16] (narrow) %v654_v32, 32  ;;  %v674_v22 = vpop.permute.xlu1 %673 }
 0x172   : > { %701 = vxpose.xlu1.b32.cont [3/16] (narrow) %v656_v36, 32  ;;  %v676_v48 = vpop.permute.xlu1 %675 }
 0x176   : > { %702 = vxpose.xlu1.b32.cont [4/16] (narrow) %v658_v38, 32 }
 0x17a   : > { %703 = vxpose.xlu1.b32.cont [5/16] (narrow) %v660_v41, 32 }
 0x17e   : > { %704 = vxpose.xlu1.b32.cont [6/16] (narrow) %v662_v42, 32 }
 0x182   : > { %705 = vxpose.xlu1.b32.cont [7/16] (narrow) %v664_v43, 32 }
 0x184   : > { %736 = vrot.lane.b32.xlu0 %v3757_v10, %s3549_s27  ;;  %v678_v10 = vpop.permute.xlu1 %677 }
 0x186   : > { %706 = vxpose.xlu1.b32.cont [8/16] (narrow) %v666_v21, 32 }
 0x188   : > { %738 = vrot.lane.b32.xlu0 %v3760_v11, %s3549_s27  ;;  %v680_v11 = vpop.permute.xlu1 %679 }
 0x18a   : > { %707 = vxpose.xlu1.b32.cont [9/16] (narrow) %v668_v44, 32 }
 0x18c   : > { %740 = vrot.lane.b32.xlu0 %v3763_v12, %s3549_s27 }
 0x18e   : > { %708 = vxpose.xlu1.b32.cont [10/16] (narrow) %v670_v45, 32 }
 0x190   : > { %742 = vrot.lane.b32.xlu0 %v3770_v13, %s3549_s27 }
 0x192   : > { %709 = vxpose.xlu1.b32.cont [11/16] (narrow) %v672_v46, 32 }
 0x194   : > { %744 = vrot.lane.b32.xlu0 %v3773_v14, %s3549_s27  ;;  %v682_v14 = vpop.permute.xlu1 %681 }
 0x196   : > { %710 = vxpose.xlu1.b32.cont [12/16] (narrow) %v674_v22, 32 }
 0x198   : > { %746 = vrot.lane.b32.xlu0 %v3792_v17, %s3549_s27 }
 0x19a   : > { %711 = vxpose.xlu1.b32.cont [13/16] (narrow) %v676_v48, 32 }
 0x19c   : > { %748 = vrot.lane.b32.xlu0 %v3807_v20, %s3549_s27 }
 0x19e   : > { %712 = vxpose.xlu1.b32.cont [14/16] (narrow) %v678_v10, 32 }
 0x19f   : > { %v581_v12 = vpop.trf.xlu0 }
 0x1a0   : > { %750 = vrot.lane.b32.xlu0 %v3822_v23, %s3549_s27  ;;  %598 = vst [vmem:[#allocation2 + $0x40] sm:$0xff] %v581_v12 }
 0x1a2   : > { %713 = vxpose.xlu1.b32.cont [15/16] (narrow) %v680_v11, 32 }
 0x1a3   : > { %v582_v13 = vpop.trf.xlu0 }
 0x1a4   : > { %752 = vrot.lane.b32.xlu0 %v3834_v25, %s3549_s27  ;;  %599 = vst [vmem:[#allocation2 + $0x48] sm:$0xff] %v582_v13 }
 0x1a6   : > { %714 = vxpose.xlu1.b32.end [16/16] (narrow) %v682_v14, 32 }
 0x1a7   : > { %v583_v17 = vpop.trf.xlu0 }
 0x1a8   : > { %754 = vrot.lane.b32.xlu0 %v3845_v27, %s3549_s27  ;;  %600 = vst [vmem:[#allocation2 + $0x50] sm:$0xff] %v583_v17 }
 0x1aa   : > { %v367_v20 = vpop.trf.xlu1 }
 0x1ab   : > { %v584_v49 = vpop.trf.xlu0  ;;  %384 = vst [vmem:[#allocation2 + $0x20] sm:$0xff] %v367_v20 }
 0x1ac   : > { %758 = vrot.lane.b32.xlu0 %v3867_v31, %s3549_s27  ;;  %601 = vst [vmem:[#allocation2 + $0x58] sm:$0xff] %v584_v49 }
 0x1ae   : > { %v368_v23 = vpop.trf.xlu1 }
 0x1af   : > { %385 = vst [vmem:[#allocation2 + $0x28] sm:$0xff] %v368_v23 }
 0x1b0   : > { %760 = vrot.lane.b32.xlu0 %v3878_v33, %s3549_s27 }
 0x1b2   : > { %v369_v25 = vpop.trf.xlu1 }
 0x1b3   : > { %386 = vst [vmem:[#allocation2 + $0x30] sm:$0xff] %v369_v25 }
 0x1b4   : > { %762 = vrot.lane.b32.xlu0 %v3889_v35, %s3549_s27 }
 0x1b6   : > { %v370_v50 = vpop.trf.xlu1 }
 0x1b7   : > { %387 = vst [vmem:[#allocation2 + $0x38] sm:$0xff] %v370_v50 }
 0x1b8   : > { %764 = vrot.lane.b32.xlu0 %v3901_v37, %s3549_s27 }
 0x1bc   : > { %766 = vrot.lane.b32.xlu0 %v3913_v39, %s3549_s27 }
 0x1c4   : > { %756 = vrot.lane.b32.xlu1 %v3856_v29, %s3549_s27 }
 0x1ea   : > { %v715_v27 = vpop.trf.xlu1 }
 0x1eb   : > { %732 = vst [vmem:[#allocation2 + $0x60] sm:$0xff] %v715_v27 }
 0x1ee   : > { %v716_v31 = vpop.trf.xlu1 }
 0x1ef   : > { %733 = vst [vmem:[#allocation2 + $0x68] sm:$0xff] %v716_v31 }
 0x1f2   : > { %v717_v33 = vpop.trf.xlu1 }
 0x1f3   : > { %734 = vst [vmem:[#allocation2 + $0x70] sm:$0xff] %v717_v33 }
 0x1f6   : > { %v737_v51 = vpop.permute.xlu0 %736  ;;  %v718_v52 = vpop.trf.xlu1 }
 0x1f7   : > { %785 = vst.msk [vmem:[#allocation3 + $0x180] sm:$0xff] %vm318_vm0, %v737_v51  ;;  %735 = vst [vmem:[#allocation2 + $0x78] sm:$0xff] %v718_v52 }
 0x1fa   : > { %v739_v35 = vpop.permute.xlu0 %738 }
 0x1fb   : > { %786 = vst.msk [vmem:[#allocation3 + $0x188] sm:$0xff] %vm318_vm0, %v739_v35 }
 0x1fe   : > { %v741_v37 = vpop.permute.xlu0 %740 }
 0x1ff   : > { %787 = vst.msk [vmem:[#allocation3 + $0x190] sm:$0xff] %vm318_vm0, %v741_v37 }
 0x202   : > { %v743_v39 = vpop.permute.xlu0 %742 }
 0x203   : > { %788 = vst.msk [vmem:[#allocation3 + $0x198] sm:$0xff] %vm318_vm0, %v743_v39 }
 0x206   : > { %v745_v29 = vpop.permute.xlu0 %744 }
 0x207   : > { %789 = vst.msk [vmem:[#allocation3 + $0x1a0] sm:$0xff] %vm318_vm0, %v745_v29 }
 0x20a   : > { %v747_v53 = vpop.permute.xlu0 %746 }
 0x20b   : > { %790 = vst.msk [vmem:[#allocation3 + $0x1a8] sm:$0xff] %vm318_vm0, %v747_v53 }
 0x20e   : > { %v749_v54 = vpop.permute.xlu0 %748 }
 0x20f   : > { %791 = vst.msk [vmem:[#allocation3 + $0x1b0] sm:$0xff] %vm318_vm0, %v749_v54 }
 0x212   : > { %v751_v55 = vpop.permute.xlu0 %750 }
 0x213   : > { %792 = vst.msk [vmem:[#allocation3 + $0x1b8] sm:$0xff] %vm318_vm0, %v751_v55 }
 0x216   : > { %v753_v0 = vpop.permute.xlu0 %752 }
 0x217   : > { %793 = vst.msk [vmem:[#allocation3 + $0x1c0] sm:$0xff] %vm318_vm0, %v753_v0 }
 0x21a   : > { %v755_v57 = vpop.permute.xlu0 %754 }
 0x21b   : > { %794 = vst.msk [vmem:[#allocation3 + $0x1c8] sm:$0xff] %vm318_vm0, %v755_v57 }
 0x21e   : > { %v759_v1 = vpop.permute.xlu0 %758 }
 0x21f   : > { %796 = vst.msk [vmem:[#allocation3 + $0x1d8] sm:$0xff] %vm318_vm0, %v759_v1 }
 0x222   : > { %v761_v2 = vpop.permute.xlu0 %760 }
 0x223   : > { %797 = vst.msk [vmem:[#allocation3 + $0x1e0] sm:$0xff] %vm318_vm0, %v761_v2 }
 0x226   : > { %v763_v56 = vpop.permute.xlu0 %762 }
 0x227   : > { %798 = vst.msk [vmem:[#allocation3 + $0x1e8] sm:$0xff] %vm318_vm0, %v763_v56 }
 0x22a   : > { %v765_v3 = vpop.permute.xlu0 %764 }
 0x22b   : > { %799 = vst.msk [vmem:[#allocation3 + $0x1f0] sm:$0xff] %vm318_vm0, %v765_v3 }
 0x22e   : > { %v767_v59 = vpop.permute.xlu0 %766 }
 0x22f   : > { %800 = vst.msk [vmem:[#allocation3 + $0x1f8] sm:$0xff] %vm318_vm0, %v767_v59 }
 0x236   : > { %v757_v4 = vpop.permute.xlu1 %756 }
 0x237   : > { %795 = vst.msk [vmem:[#allocation3 + $0x1d0] sm:$0xff] %vm318_vm0, %v757_v4 }
 0x238 PF: > { %v839_v58 = vld [vmem:[#allocation2] sm:$0xff]  ;;  %v840_v61 = vld [vmem:[#allocation2 + $0x8] sm:$0xff]  ;;  %v841_v5 = vld [vmem:[#allocation2 + $0x10] sm:$0xff]  ;;  %s2546_s5 = sshll.u32 %s3526_s12, 6  ;;  %vm843_vm1 = vcmask 261120   ;;  %s3550_s4 = smov 32  }
 0x239   : > { %v2987_v6 = vpack.c.bf16 %v840_v61, %v839_v58  ;;  %v842_v7 = vld [vmem:[#allocation2 + $0x18] sm:$0xff]  ;;  %s802_s26 = sshra.s32 %s2546_s5, 3  ;;  %v1199_v60 = vld [vmem:[#allocation2 + $0x20] sm:$0xff]  ;;  %v1200_v8 = vld [vmem:[#allocation2 + $0x28] sm:$0xff]  ;;  %s3551_s3 = smov 64   ;;  %vm1590_vm2 = vcmask 523520  }
 0x23a   : > { %v2991_v63 = vpack.c.bf16 %v842_v7, %v841_v5  ;;  %s2586_s17 = smul.u32 24, %s802_s26  ;;  %v3027_v62 = vpack.c.bf16 %v1200_v8, %v1199_v60  ;;  %v1201_v9 = vld [vmem:[#allocation2 + $0x30] sm:$0xff]  ;;  %v1202_v15 = vld [vmem:[#allocation2 + $0x38] sm:$0xff]  ;;  %vm2007_vm3 = vcmask 785920   ;;  %vm2424_vm4 = vcmask 1048320   ;;  %s2581_s23 = sshll.u32 %s3526_s12, 3 }
 0x23b   : > { %2988 = vmatprep.subr.bf16.mxu1 %v2987_v6  ;;  %v3031_v24 = vpack.c.bf16 %v1202_v15, %v1201_v9  ;;  %s2582_s25 = sshll.u32 %s3530_s13, 4  ;;  %s2449_s5 = sshll.u32 %s3722_s24, 4  ;;  %s4612_s5 = int_to_ptr.vmem [resolvable:$true] %s2449_s5 }
 0x23c   : > { %2990 = vmatpush3.bf16.msra.mxu1 %v2987_v6  ;;  %s4166_s21 = scalar_lea.vmem %s3713_s18, %s2586_s17 [#allocation4]  ;;  %3028 = vmatprep.subr.bf16.mxu0 %v3027_v62  ;;  %s3552_s18 = smov 96  }
 0x23d   : > { %2992 = vmatprep.subr.bf16.mxu1 %v2991_v63  ;;  %v807_v26 = vld [vmem:[%s4166_s21] sm:$0xff]  ;;  %v810_v28 = vld [vmem:[%s4166_s21 + $0x18] sm:$0xff]  ;;  %v813_v30 = vld [vmem:[%s4166_s21 + $0x30] sm:$0xff]  ;;  %3030 = vmatpush3.bf16.msra.mxu0 %v3027_v62  ;;  %s2446_s22 = sadd.s32 %s2582_s25, %s2581_s23  ;;  %s4620_s17 = scalar_lea.sflag [#allocation6], %s146_s9 }
 0x23e   : > { %v831_v16 = vmul.f32 0.17677669, %v807_v26  ;;  %v833_v32 = vmul.f32 0.17677669, %v813_v30  ;;  %3032 = vmatprep.subr.bf16.mxu0 %v3031_v24  ;;  %v832_v34 = vmul.f32 0.17677669, %v810_v28 }
 0x23f   : > { %v816_v36 = vld [vmem:[%s4166_s21 + $0x48] sm:$0xff]  ;;  %v819_v40 = vld [vmem:[%s4166_s21 + $0x60] sm:$0xff]  ;;  %v822_v41 = vld [vmem:[%s4166_s21 + $0x78] sm:$0xff]  ;;  %s2583_s27 = sshll.u32 %s2446_s22, 7  ;;  %p4690_p2 = scmp.ne.s32.totalorder %s4686_s28, 0 }
 0x240   : > { %2994 = vmatpush3.bf16.msra.mxu1 %v2991_v63  ;;  %1203 = vrot.lane.b32.xlu0 %v831_v16, %s3550_s4  ;;  %v834_v38 = vmul.f32 0.17677669, %v816_v36  ;;  %v835_v18 = vmul.f32 0.17677669, %v819_v40  ;;  %v836_v47 = vmul.f32 0.17677669, %v822_v41  ;;  %s4610_s26 = scalar_lea.hbm %s4682_s1, %s2583_s27 }
 0x241   : > { %2739 = vmatprep.mubr.msk.f32.mxu1 %vm843_vm1, %v831_v16  ;;  %1207 = vrot.lane.b32.xlu1 %v833_v32, %s3550_s4  ;;  %v825_v42 = vld [vmem:[%s4166_s21 + $0x90] sm:$0xff]  ;;  %v828_v43 = vld [vmem:[%s4166_s21 + $0xa8] sm:$0xff]  ;;  %v811_v0 = vld [vmem:[%s4166_s21 + $0x20] sm:$0xff] }
 0x242   : > { %3034 = vmatpush3.bf16.msra.mxu0 %v3031_v24  ;;  %v837_v19 = vmul.f32 0.17677669, %v825_v42  ;;  %v838_v21 = vmul.f32 0.17677669, %v828_v43  ;;  %v808_v29 = vld [vmem:[%s4166_s21 + $0x8] sm:$0xff]  ;;  %v809_v54 = vld [vmem:[%s4166_s21 + $0x10] sm:$0xff] }
 0x243   : > { %2740 = vmatmul.mubr.msk.f32.vlgmr.msra.gmra.mrb[0].mxu1 %vm843_vm1, %v832_v34  ;;  %v1599_v53 = vmul.f32 0.17677669, %v808_v29  ;;  %v2016_v55 = vmul.f32 0.17677669, %v809_v54  ;;  %v1600_v57 = vmul.f32 0.17677669, %v811_v0 }
 0x244   : > { %1205 = vrot.lane.b32.xlu0 %v832_v34, %s3550_s4  ;;  %2742 = vmatprep.mubr.msk.f32.mxu1 %vm843_vm1, %v833_v32  ;;  %v812_v8 = vld [vmem:[%s4166_s21 + $0x28] sm:$0xff]  ;;  %v1069_v34 = vld [vmem:[#allocation3] sm:$0xff]  ;;  %v1072_v41 = vld [vmem:[#allocation3 + $0x18] sm:$0xff] }
 0x245   : > { %1209 = vrot.lane.b32.xlu1 %v834_v38, %s3550_s4  ;;  %v2017_v63 = vmul.f32 0.17677669, %v812_v8  ;;  %v1070_v36 = vld [vmem:[#allocation3 + $0x8] sm:$0xff]  ;;  %v1081_v29 = vld [vmem:[#allocation3 + $0x60] sm:$0xff] }
 0x246   : > { %v2995_v40 = vpack.c.bf16 %v1070_v36, %v1069_v34  ;;  %v1074_v43 = vld [vmem:[#allocation3 + $0x28] sm:$0xff]  ;;  %v1439_v36 = vld [vmem:[#allocation3 + $0x90] sm:$0xff] }
 0x247   : > { %2743 = vmatmul.mubr.msk.f32.gmra.mrb[2].mxu1 %vm843_vm1, %v834_v38  ;;  %v1071_v38 = vld [vmem:[#allocation3 + $0x10] sm:$0xff]  ;;  %v1438_v34 = vld [vmem:[#allocation3 + $0x88] sm:$0xff] }
 0x248   : > { %2745 = vmatprep.mubr.msk.f32.mxu1 %vm843_vm1, %v835_v18  ;;  %1211 = vrot.lane.b32.xlu0 %v835_v18, %s3550_s4  ;;  %v2999_v42 = vpack.c.bf16 %v1072_v41, %v1071_v38  ;;  %v1440_v38 = vld [vmem:[#allocation3 + $0x98] sm:$0xff] }
 0x249   : > { %1213 = vrot.lane.b32.xlu1 %v836_v47, %s3550_s4  ;;  %2996 = vmatprep.subr.bf16.mxu1 %v2995_v40  ;;  %v3039_v41 = vpack.c.bf16 %v1440_v38, %v1439_v36  ;;  %v824_v38 = vld [vmem:[%s4166_s21 + $0x88] sm:$0xff] }
 0x24a   : > { %2998 = vmatpush3.bf16.msra.mxu1 %v2995_v40 }
 0x24b   : > { %2746 = vmatmul.mubr.msk.f32.gmra.mrb[4].mxu1 %vm843_vm1, %v836_v47  ;;  %3000 = vmatprep.subr.bf16.mxu1 %v2999_v42 }
 0x24c   : > { %2748 = vmatprep.mubr.msk.f32.mxu1 %vm843_vm1, %v837_v19  ;;  %1215 = vrot.lane.b32.xlu0 %v837_v19, %s3550_s4  ;;  %v1073_v19 = vld [vmem:[#allocation3 + $0x20] sm:$0xff] }
 0x24d   : > { %1217 = vrot.lane.b32.xlu1 %v838_v21, %s3550_s4 }
 0x24e   : > { %3002 = vmatpush3.bf16.msra.mxu1 %v2999_v42 }
 0x24f   : > { %2749 = vmatmul.mubr.msk.f32.gmra.mrb[6].mxu1 %vm843_vm1, %v838_v21  ;;  %v3003_v21 = vpack.c.bf16 %v1074_v43, %v1073_v19  ;;  %v1441_v19 = vld [vmem:[#allocation3 + $0xa0] sm:$0xff]  ;;  %v1442_v43 = vld [vmem:[#allocation3 + $0xa8] sm:$0xff] }
 0x251   : > { %3004 = vmatprep.subr.bf16.mxu1 %v3003_v21 }
 0x252   : > { %3006 = vmatpush3.bf16.msra.mxu1 %v3003_v21  ;;  %v3043_v21 = vpack.c.bf16 %v1442_v43, %v1441_v19 }
 0x2b2   : > { %v1204_v44 = vpop.permute.xlu0 %1203 }
 0x2b3   : > { %2803 = vmatprep.mubr.msk.f32.mxu0 %vm843_vm1, %v1204_v44  ;;  %v1208_v45 = vpop.permute.xlu1 %1207 }
 0x2b6   : > { %v1206_v46 = vpop.permute.xlu0 %1205 }
 0x2b7   : > { %2804 = vmatmul.mubr.msk.f32.vlgmr.msra.gmra.mrb[0].mxu0 %vm843_vm1, %v1206_v46  ;;  %v1210_v22 = vpop.permute.xlu1 %1209 }
 0x2b8   : > { %2806 = vmatprep.mubr.msk.f32.mxu0 %vm843_vm1, %v1208_v45 }
 0x2ba   : > { %v1212_v48 = vpop.permute.xlu0 %1211 }
 0x2bb   : > { %2807 = vmatmul.mubr.msk.f32.gmra.mrb[2].mxu0 %vm843_vm1, %v1210_v22  ;;  %v1214_v10 = vpop.permute.xlu1 %1213 }
 0x2bc   : > { %2809 = vmatprep.mubr.msk.f32.mxu0 %vm843_vm1, %v1212_v48 }
 0x2be   : > { %v1216_v11 = vpop.permute.xlu0 %1215 }
 0x2bf   : > { %2810 = vmatmul.mubr.msk.f32.gmra.mrb[4].mxu0 %vm843_vm1, %v1214_v10  ;;  %v1218_v12 = vpop.permute.xlu1 %1217  ;;  %v1075_v10 = vld [vmem:[#allocation3 + $0x30] sm:$0xff] }
 0x2c0   : > { %2812 = vmatprep.mubr.msk.f32.mxu0 %vm843_vm1, %v1216_v11  ;;  %v1076_v11 = vld [vmem:[#allocation3 + $0x38] sm:$0xff] }
 0x2c3   : > { %2813 = vmatmul.mubr.msk.f32.gmra.mrb[6].mxu0 %vm843_vm1, %v1218_v12  ;;  %v3007_v12 = vpack.c.bf16 %v1076_v11, %v1075_v10  ;;  %v1443_v11 = vld [vmem:[#allocation3 + $0xb0] sm:$0xff] }
 0x2c5   : > { %3008 = vmatprep.subr.bf16.mxu1 %v3007_v12 }
 0x2c6   : > { %3010 = vmatpush3.bf16.msra.mxu1 %v3007_v12  ;;  %v1444_v12 = vld [vmem:[#allocation3 + $0xb8] sm:$0xff] }
 0x316   : > { %v2741_v13 = vpop.f32.mrb[0].mxu1 }
 0x317   : > { %975 = vmax.xlane.f32.xlu1 %v2741_v13  ;;  %v4200_v14 = vpop.f32.mrb[1].mxu1 }
 0x318   : > { %973 = vmax.xlane.f32.xlu0 %v4200_v14 }
 0x31a   : > { %v2744_v17 = vpop.f32.mrb[2].mxu1 }
 0x31b   : > { %v4203_v20 = vpop.f32.mrb[3].mxu1 }
 0x31c   : > { %979 = vmax.xlane.f32.xlu0 %v2744_v17  ;;  %977 = vmax.xlane.f32.xlu1 %v4203_v20 }
 0x31e   : > { %v2747_v49 = vpop.f32.mrb[4].mxu1 }
 0x31f   : > { %v4206_v23 = vpop.f32.mrb[5].mxu1 }
 0x320   : > { %983 = vmax.xlane.f32.xlu0 %v2747_v49  ;;  %981 = vmax.xlane.f32.xlu1 %v4206_v23 }
 0x322   : > { %v4209_v25 = vpop.f32.mrb[6].mxu1 }
 0x323   : > { %v4211_v50 = vpop.f32.mrb[7].mxu1 }
 0x324   : > { %985 = vmax.xlane.f32.xlu1 %v4211_v50 }
 0x38a   : > { %v4214_v27 = vpop.f32.mrb[0].mxu0 }
 0x38b   : > { %v4216_v31 = vpop.f32.mrb[1].mxu0  ;;  %1342 = vmax.xlane.f32.xlu0 %v4214_v27 }
 0x38e   : > { %v4219_v33 = vpop.f32.mrb[2].mxu0 }
 0x38f   : > { %v4221_v51 = vpop.f32.mrb[3].mxu0  ;;  %1340 = vmax.xlane.f32.xlu0 %v4216_v31 }
 0x390   : > { %1344 = vmax.xlane.f32.xlu1 %v4221_v51 }
 0x392   : > { %v4225_v52 = vpop.f32.mrb[4].mxu0 }
 0x393   : > { %v4227_v35 = vpop.f32.mrb[5].mxu0  ;;  %987 = vmax.xlane.f32.xlu0 %v4209_v25 }
 0x394   : > { %1348 = vmax.xlane.f32.xlu1 %v4227_v35 }
 0x396   : > { %v4231_v37 = vpop.f32.mrb[6].mxu0 }
 0x397   : > { %1346 = vmax.xlane.f32.xlu0 %v4219_v33  ;;  %v4234_v39 = vpop.f32.mrb[7].mxu0 }
 0x39b   : > { %1350 = vmax.xlane.f32.xlu0 %v4225_v52 }
 0x39f   : > { %1354 = vmax.xlane.f32.xlu0 %v4231_v37 }
 0x3a4   : > { %v976_v2 = vpop.xlane.xlu1 %975 }
 0x3a5   : > { %1620 = vrot.lane.b32.xlu1 %v1599_v53, %s3551_s3  ;;  %v974_v1 = vpop.xlane.xlu0 %973  ;;  %v990_v3 = vsub.f32 %v2741_v13, %v976_v2  ;;  %v1077_v13 = vld [vmem:[#allocation3 + $0x40] sm:$0xff]  ;;  %v1082_v53 = vld [vmem:[#allocation3 + $0x68] sm:$0xff]  ;;  %v1083_v2 = vld [vmem:[#allocation3 + $0x70] sm:$0xff] }
 0x3a6   : > { %v989_v15 = vsub.f32 %v4200_v14, %v974_v1  ;;  %v1078_v14 = vld [vmem:[#allocation3 + $0x48] sm:$0xff]  ;;  %v3019_v54 = vpack.c.bf16 %v1082_v53, %v1081_v29  ;;  %v1449_v53 = vld [vmem:[#allocation3 + $0xe0] sm:$0xff] }
 0x3a7   : > { %v999_v59 = vmul.f32 1.442695, %v990_v3 }
 0x3a8   : > { %v997_v26 = vmul.f32 1.442695, %v989_v15 }
 0x3a9   : > { %2037 = vrot.lane.b32.xlu1 %v2016_v55, %s3552_s18  ;;  %v980_v56 = vpop.xlane.xlu0 %979  ;;  %3262 = vpow2.f32 %v999_v59  ;;  %v978_v9 = vpop.xlane.xlu1 %977 }
 0x3aa   : > { %v992_v4 = vsub.f32 %v2744_v17, %v980_v56  ;;  %v991_v28 = vsub.f32 %v4203_v20, %v978_v9  ;;  %v3011_v17 = vpack.c.bf16 %v1078_v14, %v1077_v13  ;;  %v1079_v20 = vld [vmem:[#allocation3 + $0x50] sm:$0xff]  ;;  %v1084_v56 = vld [vmem:[#allocation3 + $0x78] sm:$0xff]  ;;  %v3047_v13 = vpack.c.bf16 %v1444_v12, %v1443_v11  ;;  %v2026_v11 = vld [vmem:[#allocation2 + $0x68] sm:$0xff] }
 0x3ab   : > { %v3023_v59 = vpack.c.bf16 %v1084_v56, %v1083_v2  ;;  %v814_v2 = vld [vmem:[%s4166_s21 + $0x38] sm:$0xff]  ;;  %v1451_v56 = vld [vmem:[#allocation3 + $0xf0] sm:$0xff] }
 0x3ac   : > { %v1003_v61 = vmul.f32 1.442695, %v992_v4  ;;  %v1001_v30 = vmul.f32 1.442695, %v991_v28  ;;  %3012 = vmatprep.subr.bf16.mxu1 %v3011_v17 }
 0x3ad   : > { %v984_v58 = vpop.xlane.xlu0 %983  ;;  %v982_v24 = vpop.xlane.xlu1 %981  ;;  %3014 = vmatpush3.bf16.msra.mxu1 %v3011_v17  ;;  %v1445_v17 = vld [vmem:[#allocation3 + $0xc0] sm:$0xff] }
 0x3ae   : > { %v994_v5 = vsub.f32 %v2747_v49, %v984_v58  ;;  %3264 = vpow2.f32 %v1003_v61  ;;  %v993_v16 = vsub.f32 %v4206_v23, %v982_v24  ;;  %v1080_v49 = vld [vmem:[#allocation3 + $0x58] sm:$0xff] }
 0x3af   : > { %v3015_v23 = vpack.c.bf16 %v1080_v49, %v1079_v20  ;;  %v1446_v20 = vld [vmem:[#allocation3 + $0xc8] sm:$0xff] }
 0x3b0   : > { %v1007_v6 = vmul.f32 1.442695, %v994_v5  ;;  %v1005_v18 = vmul.f32 1.442695, %v993_v16  ;;  %v3051_v49 = vpack.c.bf16 %v1446_v20, %v1445_v17 }
 0x3b1   : > { %v986_v32 = vpop.xlane.xlu1 %985  ;;  %3016 = vmatprep.subr.bf16.mxu1 %v3015_v23 }
 0x3b2   : > { %3266 = vpow2.f32 %v1007_v6  ;;  %v995_v47 = vsub.f32 %v4211_v50, %v986_v32  ;;  %3018 = vmatpush3.bf16.msra.mxu1 %v3015_v23  ;;  %v1447_v23 = vld [vmem:[#allocation3 + $0xd0] sm:$0xff] }
 0x3b3   : > { %v4245_v7 = vpop.eup %3262  ;;  %3268 = vpow2.f32 %v997_v26  ;;  %3020 = vmatprep.subr.bf16.mxu1 %v3019_v54 }
 0x3b4   : > { %3270 = vpow2.f32 %v1001_v30  ;;  %v1009_v44 = vmul.f32 1.442695, %v995_v47 }
 0x3b5   : > { %1622 = vrot.lane.b32.xlu0 %v1600_v57, %s3551_s3  ;;  %3272 = vpow2.f32 %v1005_v18 }
 0x3b6   : > { %3274 = vpow2.f32 %v1009_v44  ;;  %3022 = vmatpush3.bf16.msra.mxu1 %v3019_v54  ;;  %v817_v44 = vld [vmem:[%s4166_s21 + $0x50] sm:$0xff]  ;;  %v1450_v54 = vld [vmem:[#allocation3 + $0xe8] sm:$0xff] }
 0x3b7   : > { %3024 = vmatprep.subr.bf16.mxu1 %v3023_v59  ;;  %v1602_v14 = vmul.f32 0.17677669, %v817_v44  ;;  %v2025_v44 = vld [vmem:[#allocation2 + $0x60] sm:$0xff] }
 0x3b8   : > { %v4248_v60 = vpop.eup %3264 }
 0x3ba   : > { %3026 = vmatpush3.bf16.msra.mxu1 %v3023_v59 }
 0x3bc   : > { %v4252_v62 = vpop.eup %3266 }
 0x3bd   : > { %v4260_v45 = vpop.eup %3268 }
 0x3be   : > { %v4263_v46 = vpop.eup %3270 }
 0x3bf   : > { %v4266_v22 = vpop.eup %3272 }
 0x3c0   : > { %v4269_v48 = vpop.eup %3274 }
 0x3cd   : > { %1352 = vmax.xlane.f32.xlu1 %v4234_v39 }
 0x3d4   : > { %1015 = vadd.xlane.f32.xlu0 %v4245_v7 }
 0x3d8   : > { %1019 = vadd.xlane.f32.xlu0 %v4248_v60 }
 0x3dc   : > { %1023 = vadd.xlane.f32.xlu0 %v4252_v62 }
 0x3de   : > { %2039 = vrot.lane.b32.xlu1 %v2017_v63, %s3552_s18 }
 0x402   : > { %1013 = vadd.xlane.f32.xlu1 %v4260_v45 }
 0x406   : > { %1017 = vadd.xlane.f32.xlu1 %v4263_v46 }
 0x40a   : > { %1021 = vadd.xlane.f32.xlu1 %v4266_v22 }
 0x40e   : > { %1025 = vadd.xlane.f32.xlu1 %v4269_v48 }
 0x418   : > { %v1343_v50 = vpop.xlane.xlu0 %1342 }
 0x419   : > { %v1357_v4 = vsub.f32 %v4214_v27, %v1343_v50  ;;  %v1448_v50 = vld [vmem:[#allocation3 + $0xd8] sm:$0xff] }
 0x41a   : > { %v3055_v29 = vpack.c.bf16 %v1448_v50, %v1447_v23 }
 0x41b   : > { %v1366_v63 = vmul.f32 1.442695, %v1357_v4 }
 0x41c   : > { %v1341_v55 = vpop.xlane.xlu0 %1340 }
 0x41d   : > { %v1356_v0 = vsub.f32 %v4216_v31, %v1341_v55  ;;  %v1345_v57 = vpop.xlane.xlu1 %1344  ;;  %v1608_v55 = vld [vmem:[#allocation2 + $0x40] sm:$0xff] }
 0x41e   : > { %v1358_v1 = vsub.f32 %v4221_v51, %v1345_v57  ;;  %v1609_v57 = vld [vmem:[#allocation2 + $0x48] sm:$0xff] }
 0x41f   : > { %v1364_v3 = vmul.f32 1.442695, %v1356_v0  ;;  %v3059_v0 = vpack.c.bf16 %v1450_v54, %v1449_v53 }
 0x420   : > { %v1368_v58 = vmul.f32 1.442695, %v1358_v1  ;;  %v988_v61 = vpop.xlane.xlu0 %987  ;;  %v4306_v1 = vpack.c.bf16 %v1609_v57, %v1608_v55 }
 0x421   : > { %3276 = vpow2.f32 %v1364_v3  ;;  %v996_v5 = vsub.f32 %v4209_v25, %v988_v61  ;;  %v1349_v6 = vpop.xlane.xlu1 %1348  ;;  %v1452_v3 = vld [vmem:[#allocation3 + $0xf8] sm:$0xff]  ;;  %v815_v61 = vld [vmem:[%s4166_s21 + $0x40] sm:$0xff] }
 0x422   : > { %v1360_v31 = vsub.f32 %v4227_v35, %v1349_v6  ;;  %3278 = vpow2.f32 %v1368_v58  ;;  %3068 = vmatprep.subr.bf16.mxu1 %v4306_v1  ;;  %v3063_v4 = vpack.c.bf16 %v1452_v3, %v1451_v56  ;;  %v1601_v58 = vmul.f32 0.17677669, %v814_v2 }
 0x423   : > { %v1011_v8 = vmul.f32 1.442695, %v996_v5  ;;  %v2018_v6 = vmul.f32 0.17677669, %v815_v61 }
 0x424   : > { %v1347_v51 = vpop.xlane.xlu0 %1346  ;;  %v1372_v9 = vmul.f32 1.442695, %v1360_v31  ;;  %v820_v31 = vld [vmem:[%s4166_s21 + $0x68] sm:$0xff] }
 0x425   : > { %3280 = vpow2.f32 %v1011_v8  ;;  %v1359_v15 = vsub.f32 %v4219_v33, %v1347_v51  ;;  %v1437_v33 = vld [vmem:[#allocation3 + $0x80] sm:$0xff]  ;;  %v4310_v59 = vpop.permute.xlu1 %1620 }
 0x426   : > { %3282 = vpow2.f32 %v1366_v63  ;;  %v1603_v63 = vmul.f32 0.17677669, %v820_v31 }
 0x427   : > { %3284 = vpow2.f32 %v1372_v9  ;;  %v1370_v24 = vmul.f32 1.442695, %v1359_v15  ;;  %v821_v9 = vld [vmem:[%s4166_s21 + $0x70] sm:$0xff] }
 0x428   : > { %v1351_v27 = vpop.xlane.xlu0 %1350 }
 0x429   : > { %v1361_v26 = vsub.f32 %v4225_v52, %v1351_v27  ;;  %3286 = vpow2.f32 %v1370_v24  ;;  %v3035_v52 = vpack.c.bf16 %v1438_v34, %v1437_v33  ;;  %v4313_v5 = vpop.permute.xlu1 %2037  ;;  %v2020_v27 = vmul.f32 0.17677669, %v821_v9  ;;  %v826_v24 = vld [vmem:[%s4166_s21 + $0x98] sm:$0xff]  ;;  %v823_v34 = vld [vmem:[%s4166_s21 + $0x80] sm:$0xff] }
 0x42a   : > { %v1604_v36 = vmul.f32 0.17677669, %v823_v34  ;;  %v1611_v9 = vld [vmem:[#allocation2 + $0x58] sm:$0xff] }
 0x42b   : > { %v4279_v25 = vpop.eup %3276  ;;  %v1374_v35 = vmul.f32 1.442695, %v1361_v26  ;;  %3036 = vmatprep.subr.bf16.mxu0 %v3035_v52  ;;  %v1605_v26 = vmul.f32 0.17677669, %v826_v24 }
 0x42c   : > { %v1355_v28 = vpop.xlane.xlu0 %1354  ;;  %1380 = vadd.xlane.f32.xlu1 %v4279_v25  ;;  %v4283_v16 = vpop.eup %3278  ;;  %3038 = vmatpush3.bf16.msra.mxu0 %v3035_v52 }
 0x42d   : > { %v1363_v30 = vsub.f32 %v4231_v37, %v1355_v28  ;;  %3288 = vpow2.f32 %v1374_v35  ;;  %3040 = vmatprep.subr.bf16.mxu0 %v3039_v41  ;;  %v827_v28 = vld [vmem:[%s4166_s21 + $0xa0] sm:$0xff] }
 0x42e   : > { %v2022_v35 = vmul.f32 0.17677669, %v827_v28 }
 0x42f   : > { %v4285_v32 = vpop.eup %3280  ;;  %v1378_v40 = vmul.f32 1.442695, %v1363_v30 }
 0x430   : > { %1027 = vadd.xlane.f32.xlu0 %v4285_v32  ;;  %1384 = vadd.xlane.f32.xlu1 %v4283_v16  ;;  %v4289_v18 = vpop.eup %3282  ;;  %v4332_v52 = vpop.permute.xlu0 %1622 }
 0x431   : > { %v4291_v37 = vpop.eup %3284  ;;  %3290 = vpow2.f32 %v1378_v40  ;;  %3042 = vmatpush3.bf16.msra.mxu0 %v3039_v41  ;;  %v2021_v40 = vmul.f32 0.17677669, %v824_v38  ;;  %v829_v41 = vld [vmem:[%s4166_s21 + $0xb0] sm:$0xff] }
 0x432   : > { %3044 = vmatprep.subr.bf16.mxu0 %v3043_v21  ;;  %v1606_v43 = vmul.f32 0.17677669, %v829_v41 }
 0x433   : > { %v4295_v47 = vpop.eup %3286 }
 0x434   : > { %1382 = vadd.xlane.f32.xlu0 %v4289_v18  ;;  %1388 = vadd.xlane.f32.xlu1 %v4291_v37 }
 0x435   : > { %3046 = vmatpush3.bf16.msra.mxu0 %v3043_v21  ;;  %v830_v21 = vld [vmem:[%s4166_s21 + $0xb8] sm:$0xff] }
 0x436   : > { %3048 = vmatprep.subr.bf16.mxu0 %v3047_v13  ;;  %v2023_v12 = vmul.f32 0.17677669, %v830_v21 }
 0x437   : > { %v4298_v42 = vpop.eup %3288 }
 0x438   : > { %1386 = vadd.xlane.f32.xlu0 %v4295_v47 }
 0x439   : > { %3050 = vmatpush3.bf16.msra.mxu0 %v3047_v13  ;;  %v4340_v13 = vpack.c.bf16 %v2026_v11, %v2025_v44 }
 0x43a   : > { %3052 = vmatprep.subr.bf16.mxu0 %v3051_v49 }
 0x43b   : > { %v4302_v10 = vpop.eup %3290 }
 0x43c   : > { %1390 = vadd.xlane.f32.xlu0 %v4298_v42 }
 0x43d   : > { %3054 = vmatpush3.bf16.msra.mxu0 %v3051_v49 }
 0x43e   : > { %3056 = vmatprep.subr.bf16.mxu0 %v3055_v29 }
 0x440   : > { %1394 = vadd.xlane.f32.xlu0 %v4302_v10 }
 0x441   : > { %3058 = vmatpush3.bf16.msra.mxu0 %v3055_v29 }
 0x442   : > { %3060 = vmatprep.subr.bf16.mxu0 %v3059_v0 }
 0x445   : > { %1626 = vrot.lane.b32.xlu1 %v1602_v14, %s3551_s3  ;;  %3062 = vmatpush3.bf16.msra.mxu0 %v3059_v0 }
 0x446   : > { %3064 = vmatprep.subr.bf16.mxu0 %v3063_v4 }
 0x449   : > { %3066 = vmatpush3.bf16.msra.mxu0 %v3063_v4 }
 0x44a   : > { %3108 = vmatprep.subr.bf16.mxu0 %v4340_v13 }
 0x456   : > { %1624 = vrot.lane.b32.xlu0 %v1601_v58, %s3551_s3 }
 0x45a   : > { %v1353_v8 = vpop.xlane.xlu1 %1352  ;;  %2041 = vrot.lane.b32.xlu0 %v2018_v6, %s3552_s18 }
 0x45b   : > { %v1362_v51 = vsub.f32 %v4234_v39, %v1353_v8  ;;  %v818_v39 = vld [vmem:[%s4166_s21 + $0x58] sm:$0xff]  ;;  %s3420_s21 = scalar_lea.vmem %s4612_s5, 1024 }
 0x45c   : > { %v2019_v33 = vmul.f32 0.17677669, %v818_v39  ;;  %p3421_p7 = scmp.ne.s32.totalorder %s4612_s5, %s3420_s21 }
 0x45d   : > { %v1376_v15 = vmul.f32 1.442695, %v1362_v51  ;;  %v1610_v51 = vld [vmem:[#allocation2 + $0x50] sm:$0xff] }
 0x45e   : > { %1628 = vrot.lane.b32.xlu0 %v1603_v63, %s3551_s3  ;;  %v4343_v17 = vpop.permute.xlu1 %2039  ;;  %v3071_v39 = vpack.c.bf16 %v1611_v9, %v1610_v51  ;;  %p3422_p4 = pnand %p3421_p7, %p4690_p2 }
 0x45f   : > { %3292 = vpow2.f32 %v1376_v15 }
 0x460   : > { %p3423_p0 = pneg %p3422_p4 }
 0x461   : > { %v1016_v19 = vpop.xlane.xlu0 %1015 }
 0x462   : > { %2045 = vrot.lane.b32.xlu0 %v2020_v27, %s3552_s18  ;;  %3294 = vrcp.f32 %v1016_v19 }
 0x465   : > { %v1020_v14 = vpop.xlane.xlu0 %1019 }
 0x466   : > { %1632 = vrot.lane.b32.xlu0 %v1605_v26, %s3551_s3  ;;  %3296 = vrcp.f32 %v1020_v14 }
 0x469   : > { %v4325_v30 = vpop.eup %3292  ;;  %v1024_v20 = vpop.xlane.xlu0 %1023 }
 0x46a   : > { %1392 = vadd.xlane.f32.xlu1 %v4325_v30  ;;  %2049 = vrot.lane.b32.xlu0 %v2022_v35, %s3552_s18 }
 0x46c   : > { %v3295_v23 = vpop.eup %3294 }
 0x46d   : > { %v1038_v29 = vmul.f32 %v3295_v23, %v1016_v19 }
 0x46f   : > { %v1046_v0 = vsub.f32 2.0, %v1038_v29 }
 0x470   : > { %v3297_v53 = vpop.eup %3296 }
 0x471   : > { %v1040_v57 = vmul.f32 %v3297_v53, %v1020_v14  ;;  %v1054_v61 = vmul.f32 %v3295_v23, %v1046_v0 }
 0x473   : > { %v1048_v6 = vsub.f32 2.0, %v1040_v57  ;;  %v1062_v26 = vmul.f32 %v4245_v7, %v1054_v61 }
 0x475   : > { %v1056_v28 = vmul.f32 %v3297_v53, %v1048_v6 }
 0x477   : > { %v1064_v19 = vmul.f32 %v4248_v60, %v1056_v28 }
 0x47b   : > { %2043 = vrot.lane.b32.xlu1 %v2019_v33, %s3552_s18 }
 0x47f   : > { %1630 = vrot.lane.b32.xlu1 %v1604_v36, %s3551_s3 }
 0x483   : > { %2047 = vrot.lane.b32.xlu1 %v2021_v40, %s3552_s18 }
 0x487   : > { %1634 = vrot.lane.b32.xlu1 %v1606_v43, %s3551_s3 }
 0x48b   : > { %2051 = vrot.lane.b32.xlu1 %v2023_v12, %s3552_s18 }
 0x48f   : > { %v1014_v49 = vpop.xlane.xlu1 %1013 }
 0x490   : > { %3298 = vrcp.f32 %v1014_v49 }
 0x491   : > { %3300 = vrcp.f32 %v1024_v20 }
 0x493   : > { %v1018_v50 = vpop.xlane.xlu1 %1017 }
 0x494   : > { %3302 = vrcp.f32 %v1018_v50 }
 0x497   : > { %v1022_v54 = vpop.xlane.xlu1 %1021 }
 0x498   : > { %3304 = vrcp.f32 %v1022_v54 }
 0x49a   : > { %v3299_v55 = vpop.eup %3298 }
 0x49b   : > { %v3301_v2 = vpop.eup %3300  ;;  %v1037_v56 = vmul.f32 %v3299_v55, %v1014_v49  ;;  %v1026_v3 = vpop.xlane.xlu1 %1025 }
 0x49c   : > { %3306 = vrcp.f32 %v1026_v3  ;;  %v1042_v31 = vmul.f32 %v3301_v2, %v1024_v20 }
 0x49d   : > { %v1045_v4 = vsub.f32 2.0, %v1037_v56 }
 0x49e   : > { %v3303_v58 = vpop.eup %3302  ;;  %v1050_v35 = vsub.f32 2.0, %v1042_v31 }
 0x49f   : > { %v1053_v8 = vmul.f32 %v3299_v55, %v1045_v4  ;;  %v1039_v63 = vmul.f32 %v3303_v58, %v1018_v50 }
 0x4a0   : > { %v1058_v41 = vmul.f32 %v3301_v2, %v1050_v35 }
 0x4a1   : > { %v1047_v15 = vsub.f32 2.0, %v1039_v63  ;;  %v1061_v27 = vmul.f32 %v4260_v45, %v1053_v8 }
 0x4a2   : > { %v3305_v24 = vpop.eup %3304  ;;  %v1066_v44 = vmul.f32 %v4252_v62, %v1058_v41 }
 0x4a3   : > { %v1055_v33 = vmul.f32 %v3303_v58, %v1047_v15  ;;  %v1041_v34 = vmul.f32 %v3305_v24, %v1022_v54  ;;  %2783 = vmatprep.mubr.f32.mxu1 %v1061_v27 }
 0x4a4   : > { %2784 = vmatmul.mubr.f32.vlgmr.msra.gmra.mrb[8].mxu1 %v1062_v26  ;;  %v2027_v26 = vld [vmem:[#allocation2 + $0x70] sm:$0xff] }
 0x4a5   : > { %v1049_v36 = vsub.f32 2.0, %v1041_v34  ;;  %v1063_v38 = vmul.f32 %v4263_v46, %v1055_v33  ;;  %3070 = vmatpush3.bf16.msra.mxu1 %v4306_v1 }
 0x4a6   : > { %v3307_v40 = vpop.eup %3306  ;;  %3072 = vmatprep.subr.bf16.mxu1 %v3071_v39 }
 0x4a7   : > { %v1057_v45 = vmul.f32 %v3305_v24, %v1049_v36  ;;  %v1043_v43 = vmul.f32 %v3307_v40, %v1026_v3  ;;  %2786 = vmatprep.mubr.f32.mxu1 %v1063_v38 }
 0x4a8   : > { %2787 = vmatmul.mubr.f32.gmra.mrb[10].mxu1 %v1064_v19 }
 0x4a9   : > { %v1051_v7 = vsub.f32 2.0, %v1043_v43  ;;  %v1065_v21 = vmul.f32 %v4266_v22, %v1057_v45  ;;  %3074 = vmatpush3.bf16.msra.mxu1 %v3071_v39 }
 0x4ab   : > { %v1059_v11 = vmul.f32 %v3307_v40, %v1051_v7  ;;  %2789 = vmatprep.mubr.f32.mxu1 %v1065_v21 }
 0x4ac   : > { %2790 = vmatmul.mubr.f32.gmra.mrb[12].mxu1 %v1066_v44 }
 0x4ad   : > { %v1067_v46 = vmul.f32 %v4269_v48, %v1059_v11 }
 0x4af   : > { %2792 = vmatprep.mubr.f32.mxu1 %v1067_v46 }
 0x4b9   : > { %v1381_v1 = vpop.xlane.xlu1 %1380 }
 0x4ba   : > { %3308 = vrcp.f32 %v1381_v1 }
 0x4bd   : > { %v1028_v60 = vpop.xlane.xlu0 %1027  ;;  %v1385_v12 = vpop.xlane.xlu1 %1384 }
 0x4be   : > { %3310 = vrcp.f32 %v1028_v60 }
 0x4bf   : > { %3312 = vrcp.f32 %v1385_v12 }
 0x4c1   : > { %v1383_v14 = vpop.xlane.xlu0 %1382  ;;  %v1389_v20 = vpop.xlane.xlu1 %1388 }
 0x4c2   : > { %3314 = vrcp.f32 %v1383_v14 }
 0x4c3   : > { %3316 = vrcp.f32 %v1389_v20 }
 0x4c4   : > { %v3309_v22 = vpop.eup %3308 }
 0x4c5   : > { %v1404_v49 = vmul.f32 %v3309_v22, %v1381_v1  ;;  %v1387_v23 = vpop.xlane.xlu0 %1386 }
 0x4c6   : > { %3318 = vrcp.f32 %v1387_v23 }
 0x4c7   : > { %v1412_v62 = vsub.f32 2.0, %v1404_v49 }
 0x4c8   : > { %v3311_v50 = vpop.eup %3310 }
 0x4c9   : > { %v3313_v29 = vpop.eup %3312  ;;  %v1420_v53 = vmul.f32 %v3309_v22, %v1412_v62  ;;  %v1044_v48 = vmul.f32 %v3311_v50, %v1028_v60  ;;  %v1391_v54 = vpop.xlane.xlu0 %1390 }
 0x4ca   : > { %v1406_v55 = vmul.f32 %v3313_v29, %v1385_v12  ;;  %3320 = vrcp.f32 %v1391_v54 }
 0x4cb   : > { %v1052_v0 = vsub.f32 2.0, %v1044_v48  ;;  %v1428_v57 = vmul.f32 %v4279_v25, %v1420_v53  ;;  %v2028_v25 = vld [vmem:[#allocation2 + $0x78] sm:$0xff] }
 0x4cc   : > { %v3315_v2 = vpop.eup %3314  ;;  %v1414_v56 = vsub.f32 2.0, %v1406_v55 }
 0x4cd   : > { %v3317_v3 = vpop.eup %3316  ;;  %v1060_v4 = vmul.f32 %v3311_v50, %v1052_v0  ;;  %v1405_v58 = vmul.f32 %v3315_v2, %v1383_v14  ;;  %v1395_v61 = vpop.xlane.xlu0 %1394  ;;  %2847 = vmatprep.mubr.f32.mxu0 %v1428_v57 }
 0x4ce   : > { %v1408_v6 = vmul.f32 %v3317_v3, %v1389_v20  ;;  %v1422_v51 = vmul.f32 %v3313_v29, %v1414_v56  ;;  %3322 = vrcp.f32 %v1395_v61 }
 0x4cf   : > { %v1413_v31 = vsub.f32 2.0, %v1405_v58  ;;  %v1068_v8 = vmul.f32 %v4285_v32, %v1060_v4  ;;  %v3111_v32 = vpack.c.bf16 %v2028_v25, %v2027_v26 }
 0x4d0   : > { %v3319_v63 = vpop.eup %3318  ;;  %v1416_v9 = vsub.f32 2.0, %v1408_v6  ;;  %v1430_v34 = vmul.f32 %v4283_v16, %v1422_v51 }
 0x4d1   : > { %v1421_v15 = vmul.f32 %v3315_v2, %v1413_v31  ;;  %v1407_v27 = vmul.f32 %v3319_v63, %v1387_v23  ;;  %2793 = vmatmul.mubr.f32.gmra.mrb[14].mxu1 %v1068_v8  ;;  %v1625_v24 = vpop.permute.xlu0 %1624 }
 0x4d2   : > { %2867 = vmatprep.mubr.msk.f32.mxu1 %vm843_vm1, %v4310_v59  ;;  %v1424_v33 = vmul.f32 %v3317_v3, %v1416_v9 }
 0x4d3   : > { %v1429_v28 = vmul.f32 %v4289_v18, %v1421_v15  ;;  %v1415_v35 = vsub.f32 2.0, %v1407_v27  ;;  %v1627_v18 = vpop.permute.xlu1 %1626 }
 0x4d4   : > { %v3321_v39 = vpop.eup %3320  ;;  %v1432_v19 = vmul.f32 %v4291_v37, %v1424_v33 }
 0x4d5   : > { %v1423_v36 = vmul.f32 %v3319_v63, %v1415_v35  ;;  %v1409_v38 = vmul.f32 %v3321_v39, %v1391_v54  ;;  %2848 = vmatmul.mubr.f32.vlgmr.msra.gmra.mrb[8].mxu0 %v1429_v28  ;;  %2868 = vmatmul.mubr.msk.f32.vlgmr.msra.gmra.mrb[16].mxu1 %vm843_vm1, %v4332_v52  ;;  %v2042_v40 = vpop.permute.xlu0 %2041 }
 0x4d6   : > { %2850 = vmatprep.mubr.f32.mxu0 %v1430_v34  ;;  %2870 = vmatprep.mubr.msk.f32.mxu1 %vm843_vm1, %v1625_v24 }
 0x4d7   : > { %v1417_v41 = vsub.f32 2.0, %v1409_v38  ;;  %v1431_v59 = vmul.f32 %v4295_v47, %v1423_v36  ;;  %3110 = vmatpush3.bf16.msra.mxu0 %v4340_v13  ;;  %v1854_v36 = vld [vmem:[#allocation3 + $0x100] sm:$0xff]  ;;  %v1855_v38 = vld [vmem:[#allocation3 + $0x108] sm:$0xff] }
 0x4d8   : > { %3112 = vmatprep.subr.bf16.mxu0 %v3111_v32  ;;  %v3323_v43 = vpop.eup %3322 }
 0x4d9   : > { %v1425_v16 = vmul.f32 %v3321_v39, %v1417_v41  ;;  %2851 = vmatmul.mubr.f32.gmra.mrb[10].mxu0 %v1431_v59  ;;  %2871 = vmatmul.mubr.msk.f32.gmra.mrb[18].mxu1 %vm843_vm1, %v1627_v18  ;;  %v1629_v45 = vpop.permute.xlu0 %1628  ;;  %v1411_v37 = vmul.f32 %v3323_v43, %v1395_v61  ;;  %v3075_v59 = vpack.c.bf16 %v1855_v38, %v1854_v36  ;;  %v1857_v18 = vld [vmem:[#allocation3 + $0x118] sm:$0xff] }
 0x4da   : > { %2853 = vmatprep.mubr.f32.mxu0 %v1432_v19  ;;  %2873 = vmatprep.mubr.msk.f32.mxu1 %vm843_vm1, %v1629_v45  ;;  %v1858_v45 = vld [vmem:[#allocation3 + $0x120] sm:$0xff] }
 0x4db   : > { %v1433_v52 = vmul.f32 %v4298_v42, %v1425_v16  ;;  %3114 = vmatpush3.bf16.msra.mxu0 %v3111_v32  ;;  %v1419_v46 = vsub.f32 2.0, %v1411_v37  ;;  %3076 = vmatprep.subr.bf16.mxu1 %v3075_v59 }
 0x4dc   : > { %3078 = vmatpush3.bf16.msra.mxu1 %v3075_v59 }
 0x4dd   : > { %2854 = vmatmul.mubr.f32.gmra.mrb[12].mxu0 %v1433_v52  ;;  %v2046_v13 = vpop.permute.xlu0 %2045  ;;  %v1427_v12 = vmul.f32 %v3323_v43, %v1419_v46  ;;  %v1859_v52 = vld [vmem:[#allocation3 + $0x128] sm:$0xff] }
 0x4df   : > { %v1435_v49 = vmul.f32 %v4302_v10, %v1427_v12  ;;  %v1860_v12 = vld [vmem:[#allocation3 + $0x130] sm:$0xff] }
 0x4e1   : > { %v1633_v21 = vpop.permute.xlu0 %1632 }
 0x4f7   : > { %v1393_v47 = vpop.xlane.xlu1 %1392 }
 0x4f8   : > { %3324 = vrcp.f32 %v1393_v47 }
 0x4fb   : > { %v2044_v7 = vpop.permute.xlu1 %2043 }
 0x4ff   : > { %v1631_v44 = vpop.permute.xlu1 %1630 }
 0x500   : > { %2874 = vmatmul.mubr.msk.f32.gmra.mrb[20].mxu1 %vm843_vm1, %v1631_v44 }
 0x501   : > { %2876 = vmatprep.mubr.msk.f32.mxu1 %vm843_vm1, %v1633_v21  ;;  %v3083_v21 = vpack.c.bf16 %v1859_v52, %v1858_v45 }
 0x502   : > { %v3325_v11 = vpop.eup %3324 }
 0x503   : > { %v1410_v1 = vmul.f32 %v3325_v11, %v1393_v47  ;;  %v2048_v60 = vpop.permute.xlu1 %2047 }
 0x505   : > { %v1418_v42 = vsub.f32 2.0, %v1410_v1 }
 0x507   : > { %v1426_v14 = vmul.f32 %v3325_v11, %v1418_v42  ;;  %v1635_v20 = vpop.permute.xlu1 %1634 }
 0x508   : > { %2877 = vmatmul.mubr.msk.f32.gmra.mrb[22].mxu1 %vm843_vm1, %v1635_v20 }
 0x509   : > { %v1434_v22 = vmul.f32 %v4325_v30, %v1426_v14  ;;  %v2050_v30 = vpop.permute.xlu0 %2049  ;;  %v1861_v14 = vld [vmem:[#allocation3 + $0x138] sm:$0xff] }
 0x50a   : > { %v3087_v20 = vpack.c.bf16 %v1861_v14, %v1860_v12 }
 0x50b   : > { %2856 = vmatprep.mubr.f32.mxu0 %v1434_v22  ;;  %v2052_v10 = vpop.permute.xlu1 %2051  ;;  %v1862_v22 = vld [vmem:[#allocation3 + $0x140] sm:$0xff] }
 0x50c   : > { %2857 = vmatmul.mubr.f32.gmra.mrb[14].mxu0 %v1435_v49  ;;  %v1863_v49 = vld [vmem:[#allocation3 + $0x148] sm:$0xff] }
 0x50d   : > { %2931 = vmatprep.mubr.msk.f32.mxu0 %vm843_vm1, %v4313_v5 }
 0x510   : > { %2932 = vmatmul.mubr.msk.f32.vlgmr.msra.gmra.mrb[16].mxu0 %vm843_vm1, %v4343_v17 }
 0x511   : > { %2934 = vmatprep.mubr.msk.f32.mxu0 %vm843_vm1, %v2042_v40  ;;  %v1856_v40 = vld [vmem:[#allocation3 + $0x110] sm:$0xff] }
 0x512   : > { %v3079_v16 = vpack.c.bf16 %v1857_v18, %v1856_v40 }
 0x514   : > { %2935 = vmatmul.mubr.msk.f32.gmra.mrb[18].mxu0 %vm843_vm1, %v2044_v7  ;;  %3080 = vmatprep.subr.bf16.mxu1 %v3079_v16 }
 0x515   : > { %2937 = vmatprep.mubr.msk.f32.mxu0 %vm843_vm1, %v2046_v13  ;;  %3082 = vmatpush3.bf16.msra.mxu1 %v3079_v16 }
 0x516   : > { %3084 = vmatprep.subr.bf16.mxu1 %v3083_v21 }
 0x518   : > { %2938 = vmatmul.mubr.msk.f32.gmra.mrb[20].mxu0 %vm843_vm1, %v2048_v60 }
 0x519   : > { %2940 = vmatprep.mubr.msk.f32.mxu0 %vm843_vm1, %v2050_v30  ;;  %3086 = vmatpush3.bf16.msra.mxu1 %v3083_v21  ;;  %v3091_v30 = vpack.c.bf16 %v1863_v49, %v1862_v22 }
 0x51a   : > { %3088 = vmatprep.subr.bf16.mxu1 %v3087_v20 }
 0x51c   : > { %2941 = vmatmul.mubr.msk.f32.gmra.mrb[22].mxu0 %vm843_vm1, %v2052_v10  ;;  %v1864_v10 = vld [vmem:[#allocation3 + $0x150] sm:$0xff] }
 0x51d   : > { %3090 = vmatpush3.bf16.msra.mxu1 %v3087_v20 }
 0x51e   : > { %3092 = vmatprep.subr.bf16.mxu1 %v3091_v30 }
 0x521   : > { %3094 = vmatpush3.bf16.msra.mxu1 %v3091_v30 }
 0x577   : > { %v2785_v5 = vpop.f32.mrb[8].mxu1 }
 0x578   : > { %1191 = vst.msk [vmem:[%s3722_s24 + $0x8] sm:$0xff] %vm843_vm1, %v2785_v5  ;;  %v1151_v17 = vpop.f32.mrb[9].mxu1  ;;  %v1865_v5 = vld [vmem:[#allocation3 + $0x158] sm:$0xff] }
 0x579   : > { %1190 = vst.msk [vmem:[%s3722_s24] sm:$0xff] %vm843_vm1, %v1151_v17  ;;  %v3095_v17 = vpack.c.bf16 %v1865_v5, %v1864_v10 }
 0x57b   : > { %v2788_v23 = vpop.f32.mrb[10].mxu1  ;;  %3096 = vmatprep.subr.bf16.mxu1 %v3095_v17 }
 0x57c   : > { %1193 = vst.msk [vmem:[%s3722_s24 + $0x18] sm:$0xff] %vm843_vm1, %v2788_v23  ;;  %v1161_v62 = vpop.f32.mrb[11].mxu1  ;;  %3098 = vmatpush3.bf16.msra.mxu1 %v3095_v17  ;;  %v1866_v23 = vld [vmem:[#allocation3 + $0x160] sm:$0xff] }
 0x57d   : > { %1192 = vst.msk [vmem:[%s3722_s24 + $0x10] sm:$0xff] %vm843_vm1, %v1161_v62  ;;  %v1867_v62 = vld [vmem:[#allocation3 + $0x168] sm:$0xff]  ;;  %v2271_v17 = vld [vmem:[#allocation3 + $0x180] sm:$0xff] }
 0x57f   : > { %v2791_v50 = vpop.f32.mrb[12].mxu1 }
 0x580   : > { %1195 = vst.msk [vmem:[%s3722_s24 + $0x28] sm:$0xff] %vm843_vm1, %v2791_v50  ;;  %v1171_v29 = vpop.f32.mrb[13].mxu1  ;;  %v3099_v50 = vpack.c.bf16 %v1867_v62, %v1866_v23  ;;  %v2272_v23 = vld [vmem:[#allocation3 + $0x188] sm:$0xff] }
 0x581   : > { %1194 = vst.msk [vmem:[%s3722_s24 + $0x20] sm:$0xff] %vm843_vm1, %v1171_v29 }
 0x582   : > { %3100 = vmatprep.subr.bf16.mxu1 %v3099_v50 }
 0x583   : > { %3102 = vmatpush3.bf16.msra.mxu1 %v3099_v50 }
 0x5a4   : > { %v2794_v53 = vpop.f32.mrb[14].mxu1 }
 0x5a5   : > { %1197 = vst.msk [vmem:[%s3722_s24 + $0x38] sm:$0xff] %vm843_vm1, %v2794_v53  ;;  %v1181_v48 = vpop.f32.mrb[15].mxu1 }
 0x5a6   : > { %1196 = vst.msk [vmem:[%s3722_s24 + $0x30] sm:$0xff] %vm843_vm1, %v1181_v48 }
 0x5a8   : > { %v4400_v54 = vpop.f32.mrb[8].mxu0  ;;  %v2869_v55 = vpop.f32.mrb[16].mxu1 }
 0x5a9   : > { %1759 = vmax.xlane.f32.xlu1 %v2869_v55  ;;  %v4402_v0 = vpop.f32.mrb[9].mxu0  ;;  %v1718_v57 = vpop.f32.mrb[17].mxu1 }
 0x5aa   : > { %1757 = vmax.xlane.f32.xlu0 %v1718_v57 }
 0x5ac   : > { %v4404_v2 = vpop.f32.mrb[10].mxu0  ;;  %v2872_v56 = vpop.f32.mrb[18].mxu1 }
 0x5ad   : > { %v4406_v3 = vpop.f32.mrb[11].mxu0  ;;  %v1728_v4 = vpop.f32.mrb[19].mxu1 }
 0x5ae   : > { %1763 = vmax.xlane.f32.xlu0 %v2872_v56  ;;  %1761 = vmax.xlane.f32.xlu1 %v1728_v4 }
 0x5b0   : > { %v4408_v58 = vpop.f32.mrb[12].mxu0 }
 0x5b1   : > { %v4410_v61 = vpop.f32.mrb[13].mxu0 }
 0x5d3   : > { %v4412_v6 = vpop.f32.mrb[20].mxu1 }
 0x5d4   : > { %1767 = vmax.xlane.f32.xlu0 %v4412_v6  ;;  %v4415_v31 = vpop.f32.mrb[21].mxu1 }
 0x5d5   : > { %1765 = vmax.xlane.f32.xlu1 %v4415_v31 }
 0x5db   : > { %v4418_v8 = vpop.f32.mrb[22].mxu1 }
 0x5dc   : > { %v4420_v63 = vpop.f32.mrb[23].mxu1 }
 0x5dd   : > { %1769 = vmax.xlane.f32.xlu1 %v4420_v63 }
 0x5df   : > { %v4423_v51 = vpop.f32.mrb[14].mxu0 }
 0x5e0   : > { %v4425_v9 = vpop.f32.mrb[15].mxu0 }
 0x5e3   : > { %v4427_v15 = vpop.f32.mrb[16].mxu0 }
 0x5e4   : > { %v4429_v27 = vpop.f32.mrb[17].mxu0  ;;  %2176 = vmax.xlane.f32.xlu0 %v4427_v15 }
 0x5e7   : > { %v4432_v24 = vpop.f32.mrb[18].mxu0 }
 0x5e8   : > { %v4434_v26 = vpop.f32.mrb[19].mxu0  ;;  %2174 = vmax.xlane.f32.xlu0 %v4429_v27 }
 0x5e9   : > { %2178 = vmax.xlane.f32.xlu1 %v4434_v26 }
 0x5eb   : > { %v4438_v25 = vpop.f32.mrb[20].mxu0 }
 0x5ec   : > { %v4440_v28 = vpop.f32.mrb[21].mxu0  ;;  %1771 = vmax.xlane.f32.xlu0 %v4418_v8 }
 0x5ed   : > { %2182 = vmax.xlane.f32.xlu1 %v4440_v28 }
 0x5ef   : > { %v4444_v35 = vpop.f32.mrb[22].mxu0 }
 0x5f0   : > { %2180 = vmax.xlane.f32.xlu0 %v4432_v24  ;;  %v4447_v39 = vpop.f32.mrb[23].mxu0 }
 0x5f1   : > { %2186 = vmax.xlane.f32.xlu1 %v4447_v39 }
 0x5f4   : > { %2184 = vmax.xlane.f32.xlu0 %v4438_v25 }
 0x5f8   : > { %2188 = vmax.xlane.f32.xlu0 %v4444_v35 }
 0x636   : > { %v1760_v33 = vpop.xlane.xlu1 %1759 }
 0x637   : > { %v1774_v34 = vsub.f32 %v2869_v55, %v1760_v33  ;;  %v1758_v32 = vpop.xlane.xlu0 %1757 }
 0x638   : > { %v1773_v41 = vsub.f32 %v1718_v57, %v1758_v32  ;;  %v1868_v57 = vld [vmem:[#allocation3 + $0x170] sm:$0xff] }
 0x639   : > { %v1783_v19 = vmul.f32 1.442695, %v1774_v34 }
 0x63a   : > { %v1781_v47 = vmul.f32 1.442695, %v1773_v41 }
 0x63b   : > { %3326 = vpow2.f32 %v1783_v19  ;;  %v1764_v13 = vpop.xlane.xlu0 %1763  ;;  %v1762_v43 = vpop.xlane.xlu1 %1761 }
 0x63c   : > { %3328 = vpow2.f32 %v1781_v47  ;;  %v1776_v7 = vsub.f32 %v2872_v56, %v1764_v13  ;;  %v1775_v37 = vsub.f32 %v1728_v4, %v1762_v43  ;;  %v1869_v56 = vld [vmem:[#allocation3 + $0x178] sm:$0xff] }
 0x63d   : > { %v3103_v33 = vpack.c.bf16 %v1869_v56, %v1868_v57  ;;  %v2275_v57 = vld [vmem:[#allocation3 + $0x1a0] sm:$0xff]  ;;  %v2276_v56 = vld [vmem:[#allocation3 + $0x1a8] sm:$0xff] }
 0x63e   : > { %v1787_v44 = vmul.f32 1.442695, %v1776_v7  ;;  %v1785_v11 = vmul.f32 1.442695, %v1775_v37 }
 0x63f   : > { %3104 = vmatprep.subr.bf16.mxu1 %v3103_v33 }
 0x640   : > { %3330 = vpow2.f32 %v1787_v44  ;;  %3106 = vmatpush3.bf16.msra.mxu1 %v3103_v33 }
 0x641   : > { %3332 = vpow2.f32 %v1785_v11 }
 0x645   : > { %v4452_v46 = vpop.eup %3326 }
 0x646   : > { %v4454_v1 = vpop.eup %3328  ;;  %1799 = vadd.xlane.f32.xlu0 %v4452_v46 }
 0x647   : > { %1797 = vadd.xlane.f32.xlu1 %v4454_v1 }
 0x64a   : > { %v4458_v60 = vpop.eup %3330 }
 0x64b   : > { %v4460_v42 = vpop.eup %3332  ;;  %1803 = vadd.xlane.f32.xlu0 %v4458_v60 }
 0x64c   : > { %1801 = vadd.xlane.f32.xlu1 %v4460_v42 }
 0x661   : > { %v1768_v29 = vpop.xlane.xlu0 %1767 }
 0x662   : > { %v1778_v53 = vsub.f32 %v4412_v6, %v1768_v29  ;;  %v1766_v48 = vpop.xlane.xlu1 %1765  ;;  %v2273_v29 = vld [vmem:[#allocation3 + $0x190] sm:$0xff] }
 0x663   : > { %v1777_v55 = vsub.f32 %v4415_v31, %v1766_v48 }
 0x664   : > { %v1791_v4 = vmul.f32 1.442695, %v1778_v53  ;;  %v2274_v53 = vld [vmem:[#allocation3 + $0x198] sm:$0xff] }
 0x665   : > { %v1789_v34 = vmul.f32 1.442695, %v1777_v55  ;;  %v3119_v48 = vpack.c.bf16 %v2274_v53, %v2273_v29 }
 0x666   : > { %3334 = vpow2.f32 %v1791_v4  ;;  %v3123_v4 = vpack.c.bf16 %v2276_v56, %v2275_v57 }
 0x667   : > { %3336 = vpow2.f32 %v1789_v34  ;;  %v2277_v34 = vld [vmem:[#allocation3 + $0x1b0] sm:$0xff] }
 0x66a   : > { %v1770_v32 = vpop.xlane.xlu1 %1769 }
 0x66b   : > { %v1779_v36 = vsub.f32 %v4420_v63, %v1770_v32  ;;  %v2278_v32 = vld [vmem:[#allocation3 + $0x1b8] sm:$0xff] }
 0x66d   : > { %v1793_v38 = vmul.f32 1.442695, %v1779_v36  ;;  %v3127_v36 = vpack.c.bf16 %v2278_v32, %v2277_v34 }
 0x66f   : > { %3338 = vpow2.f32 %v1793_v38  ;;  %v2279_v38 = vld [vmem:[#allocation3 + $0x1c0] sm:$0xff] }
 0x670   : > { %v4467_v6 = vpop.eup %3334 }
 0x671   : > { %v4469_v40 = vpop.eup %3336  ;;  %v2177_v31 = vpop.xlane.xlu0 %2176  ;;  %1807 = vadd.xlane.f32.xlu0 %v4467_v6 }
 0x672   : > { %1805 = vadd.xlane.f32.xlu1 %v4469_v40  ;;  %v2191_v63 = vsub.f32 %v4427_v15, %v2177_v31  ;;  %v2280_v31 = vld [vmem:[#allocation3 + $0x1c8] sm:$0xff] }
 0x675   : > { %v2175_v41 = vpop.xlane.xlu0 %2174 }
 0x676   : > { %v2190_v59 = vsub.f32 %v4429_v27, %v2175_v41  ;;  %v2179_v18 = vpop.xlane.xlu1 %2178  ;;  %v2200_v27 = vmul.f32 1.442695, %v2191_v63  ;;  %v3131_v41 = vpack.c.bf16 %v2280_v31, %v2279_v38  ;;  %v2284_v63 = vld [vmem:[#allocation3 + $0x1e8] sm:$0xff] }
 0x677   : > { %v2192_v19 = vsub.f32 %v4434_v26, %v2179_v18  ;;  %v2282_v18 = vld [vmem:[#allocation3 + $0x1d8] sm:$0xff] }
 0x678   : > { %v2198_v16 = vmul.f32 1.442695, %v2190_v59  ;;  %v2281_v59 = vld [vmem:[#allocation3 + $0x1d0] sm:$0xff] }
 0x679   : > { %v4475_v45 = vpop.eup %3338  ;;  %v2202_v52 = vmul.f32 1.442695, %v2192_v19  ;;  %v1772_v47 = vpop.xlane.xlu0 %1771  ;;  %v3135_v19 = vpack.c.bf16 %v2282_v18, %v2281_v59 }
 0x67a   : > { %3340 = vpow2.f32 %v2198_v16  ;;  %v1780_v13 = vsub.f32 %v4418_v8, %v1772_v47  ;;  %1809 = vadd.xlane.f32.xlu1 %v4475_v45  ;;  %v2183_v43 = vpop.xlane.xlu1 %2182  ;;  %v2283_v16 = vld [vmem:[#allocation3 + $0x1e0] sm:$0xff]  ;;  %v2285_v47 = vld [vmem:[#allocation3 + $0x1f0] sm:$0xff] }
 0x67b   : > { %v2194_v7 = vsub.f32 %v4440_v28, %v2183_v43  ;;  %3342 = vpow2.f32 %v2202_v52  ;;  %v3139_v52 = vpack.c.bf16 %v2284_v63, %v2283_v16 }
 0x67c   : > { %v1795_v37 = vmul.f32 1.442695, %v1780_v13  ;;  %v2286_v13 = vld [vmem:[#allocation3 + $0x1f8] sm:$0xff] }
 0x67d   : > { %v2181_v21 = vpop.xlane.xlu0 %2180  ;;  %v2206_v26 = vmul.f32 1.442695, %v2194_v7  ;;  %v3143_v43 = vpack.c.bf16 %v2286_v13, %v2285_v47 }
 0x67e   : > { %3344 = vpow2.f32 %v1795_v37  ;;  %v2193_v44 = vsub.f32 %v4432_v24, %v2181_v21  ;;  %v2187_v11 = vpop.xlane.xlu1 %2186 }
 0x67f   : > { %v2196_v15 = vsub.f32 %v4447_v39, %v2187_v11  ;;  %3346 = vpow2.f32 %v2200_v27 }
 0x680   : > { %v2204_v12 = vmul.f32 1.442695, %v2193_v44  ;;  %3348 = vpow2.f32 %v2206_v26 }
 0x681   : > { %v2185_v14 = vpop.xlane.xlu0 %2184  ;;  %v2210_v8 = vmul.f32 1.442695, %v2196_v15 }
 0x682   : > { %v2195_v20 = vsub.f32 %v4438_v25, %v2185_v14  ;;  %3350 = vpow2.f32 %v2204_v12 }
 0x683   : > { %3352 = vpow2.f32 %v2210_v8 }
 0x684   : > { %v4484_v22 = vpop.eup %3340  ;;  %v2208_v49 = vmul.f32 1.442695, %v2195_v20 }
 0x685   : > { %v2189_v28 = vpop.xlane.xlu0 %2188  ;;  %2214 = vadd.xlane.f32.xlu1 %v4484_v22  ;;  %v4488_v30 = vpop.eup %3342 }
 0x686   : > { %v2197_v24 = vsub.f32 %v4444_v35, %v2189_v28  ;;  %3354 = vpow2.f32 %v2208_v49  ;;  %v3115_v35 = vpack.c.bf16 %v2272_v23, %v2271_v17 }
 0x688   : > { %v4490_v39 = vpop.eup %3344  ;;  %v2212_v25 = vmul.f32 1.442695, %v2197_v24  ;;  %3116 = vmatprep.subr.bf16.mxu0 %v3115_v35 }
 0x689   : > { %1811 = vadd.xlane.f32.xlu0 %v4490_v39  ;;  %2218 = vadd.xlane.f32.xlu1 %v4488_v30  ;;  %v4494_v10 = vpop.eup %3346 }
 0x68a   : > { %v4496_v5 = vpop.eup %3348  ;;  %3356 = vpow2.f32 %v2212_v25  ;;  %3118 = vmatpush3.bf16.msra.mxu0 %v3115_v35 }
 0x68b   : > { %3120 = vmatprep.subr.bf16.mxu0 %v3119_v48 }
 0x68c   : > { %v4500_v62 = vpop.eup %3350 }
 0x68d   : > { %2216 = vadd.xlane.f32.xlu0 %v4494_v10  ;;  %2222 = vadd.xlane.f32.xlu1 %v4496_v5  ;;  %v4502_v50 = vpop.eup %3352 }
 0x68e   : > { %3122 = vmatpush3.bf16.msra.mxu0 %v3119_v48 }
 0x68f   : > { %3124 = vmatprep.subr.bf16.mxu0 %v3123_v4 }
 0x690   : > { %v4506_v55 = vpop.eup %3354 }
 0x691   : > { %2220 = vadd.xlane.f32.xlu0 %v4500_v62  ;;  %2226 = vadd.xlane.f32.xlu1 %v4502_v50 }
 0x692   : > { %3126 = vmatpush3.bf16.msra.mxu0 %v3123_v4 }
 0x693   : > { %3128 = vmatprep.subr.bf16.mxu0 %v3127_v36 }
 0x694   : > { %v4509_v33 = vpop.eup %3356 }
 0x695   : > { %2224 = vadd.xlane.f32.xlu0 %v4506_v55 }
 0x696   : > { %3130 = vmatpush3.bf16.msra.mxu0 %v3127_v36 }
 0x697   : > { %3132 = vmatprep.subr.bf16.mxu0 %v3131_v41 }
 0x699   : > { %2228 = vadd.xlane.f32.xlu0 %v4509_v33 }
 0x69a   : > { %3134 = vmatpush3.bf16.msra.mxu0 %v3131_v41 }
 0x69b   : > { %3136 = vmatprep.subr.bf16.mxu0 %v3135_v19 }
 0x69e   : > { %3138 = vmatpush3.bf16.msra.mxu0 %v3135_v19 }
 0x69f   : > { %3140 = vmatprep.subr.bf16.mxu0 %v3139_v52 }
 0x6a2   : > { %1566 = vrot.lane.b32.xlu1 %v4402_v0, %s3550_s4  ;;  %3142 = vmatpush3.bf16.msra.mxu0 %v3139_v52 }
 0x6a3   : > { %3144 = vmatprep.subr.bf16.mxu0 %v3143_v43 }
 0x6a6   : > { %1570 = vrot.lane.b32.xlu1 %v4406_v3, %s3550_s4  ;;  %3146 = vmatpush3.bf16.msra.mxu0 %v3143_v43 }
 0x6aa   : > { %1572 = vrot.lane.b32.xlu1 %v4404_v2, %s3550_s4 }
 0x6ae   : > { %1576 = vrot.lane.b32.xlu1 %v4408_v58, %s3550_s4 }
 0x6af   : > { %1568 = vrot.lane.b32.xlu0 %v4400_v54, %s3550_s4 }
 0x6b2   : > { %1580 = vrot.lane.b32.xlu1 %v4423_v51, %s3550_s4 }
 0x6b3   : > { %1574 = vrot.lane.b32.xlu0 %v4410_v61, %s3550_s4 }
 0x6b7   : > { %1578 = vrot.lane.b32.xlu0 %v4425_v9, %s3550_s4  ;;  %s3553_s4 = smov [#allocation7]  }
 0x6d3   : > { %v1800_v0 = vpop.xlane.xlu0 %1799 }
 0x6d4   : > { %3358 = vrcp.f32 %v1800_v0  ;;  %v1798_v2 = vpop.xlane.xlu1 %1797 }
 0x6d5   : > { %3360 = vrcp.f32 %v1798_v2 }
 0x6d8   : > { %v1804_v3 = vpop.xlane.xlu0 %1803 }
 0x6d9   : > { %3362 = vrcp.f32 %v1804_v3  ;;  %v1802_v7 = vpop.xlane.xlu1 %1801 }
 0x6da   : > { %3364 = vrcp.f32 %v1802_v7 }
 0x6de   : > { %v3359_v58 = vpop.eup %3358 }
 0x6df   : > { %v3361_v37 = vpop.eup %3360  ;;  %v1822_v54 = vmul.f32 %v3359_v58, %v1800_v0 }
 0x6e0   : > { %v1821_v27 = vmul.f32 %v3361_v37, %v1798_v2 }
 0x6e1   : > { %v1830_v21 = vsub.f32 2.0, %v1822_v54 }
 0x6e2   : > { %v1829_v51 = vsub.f32 2.0, %v1821_v27 }
 0x6e3   : > { %v3363_v26 = vpop.eup %3362  ;;  %v1838_v44 = vmul.f32 %v3359_v58, %v1830_v21 }
 0x6e4   : > { %v3365_v61 = vpop.eup %3364  ;;  %v1837_v11 = vmul.f32 %v3361_v37, %v1829_v51  ;;  %v1824_v15 = vmul.f32 %v3363_v26, %v1804_v3 }
 0x6e5   : > { %v1823_v9 = vmul.f32 %v3365_v61, %v1802_v7  ;;  %v1846_v8 = vmul.f32 %v4452_v46, %v1838_v44 }
 0x6e6   : > { %v1832_v12 = vsub.f32 2.0, %v1824_v15  ;;  %v1845_v14 = vmul.f32 %v4454_v1, %v1837_v11 }
 0x6e7   : > { %v1831_v20 = vsub.f32 2.0, %v1823_v9 }
 0x6e8   : > { %v1840_v28 = vmul.f32 %v3363_v26, %v1832_v12  ;;  %2911 = vmatprep.mubr.f32.mxu1 %v1845_v14 }
 0x6e9   : > { %v1839_v49 = vmul.f32 %v3365_v61, %v1831_v20  ;;  %2912 = vmatmul.mubr.f32.vlgmr.msra.gmra.mrb[24].mxu1 %v1846_v8 }
 0x6ea   : > { %v1848_v24 = vmul.f32 %v4458_v60, %v1840_v28 }
 0x6eb   : > { %v1847_v25 = vmul.f32 %v4460_v42, %v1839_v49 }
 0x6ed   : > { %2914 = vmatprep.mubr.f32.mxu1 %v1847_v25 }
 0x6ee   : > { %2915 = vmatmul.mubr.f32.gmra.mrb[26].mxu1 %v1848_v24 }
 0x6fe   : > { %v1808_v17 = vpop.xlane.xlu0 %1807 }
 0x6ff   : > { %3366 = vrcp.f32 %v1808_v17  ;;  %v1806_v23 = vpop.xlane.xlu1 %1805 }
 0x700   : > { %3368 = vrcp.f32 %v1806_v23 }
 0x707   : > { %v1810_v35 = vpop.xlane.xlu1 %1809 }
 0x708   : > { %3370 = vrcp.f32 %v1810_v35 }
 0x709   : > { %v3367_v1 = vpop.eup %3366 }
 0x70a   : > { %v3369_v29 = vpop.eup %3368  ;;  %v1826_v46 = vmul.f32 %v3367_v1, %v1808_v17 }
 0x70b   : > { %v1825_v53 = vmul.f32 %v3369_v29, %v1806_v23 }
 0x70c   : > { %v1834_v48 = vsub.f32 2.0, %v1826_v46 }
 0x70d   : > { %v1833_v57 = vsub.f32 2.0, %v1825_v53 }
 0x70e   : > { %v1842_v56 = vmul.f32 %v3367_v1, %v1834_v48 }
 0x70f   : > { %v1841_v4 = vmul.f32 %v3369_v29, %v1833_v57 }
 0x710   : > { %v1850_v32 = vmul.f32 %v4467_v6, %v1842_v56 }
 0x711   : > { %v1849_v60 = vmul.f32 %v4469_v40, %v1841_v4 }
 0x712   : > { %v3371_v34 = vpop.eup %3370  ;;  %v2215_v42 = vpop.xlane.xlu1 %2214 }
 0x713   : > { %v1827_v36 = vmul.f32 %v3371_v34, %v1810_v35  ;;  %3372 = vrcp.f32 %v2215_v42  ;;  %2917 = vmatprep.mubr.f32.mxu1 %v1849_v60 }
 0x714   : > { %2918 = vmatmul.mubr.f32.gmra.mrb[28].mxu1 %v1850_v32 }
 0x715   : > { %v1835_v38 = vsub.f32 2.0, %v1827_v36 }
 0x716   : > { %v1812_v31 = vpop.xlane.xlu0 %1811  ;;  %v2219_v41 = vpop.xlane.xlu1 %2218 }
 0x717   : > { %v1843_v59 = vmul.f32 %v3371_v34, %v1835_v38  ;;  %3374 = vrcp.f32 %v1812_v31 }
 0x718   : > { %3376 = vrcp.f32 %v2219_v41 }
 0x719   : > { %v1851_v18 = vmul.f32 %v4475_v45, %v1843_v59 }
 0x71a   : > { %v2217_v19 = vpop.xlane.xlu0 %2216  ;;  %v2223_v16 = vpop.xlane.xlu1 %2222 }
 0x71b   : > { %3378 = vrcp.f32 %v2217_v19  ;;  %2920 = vmatprep.mubr.f32.mxu1 %v1851_v18 }
 0x71c   : > { %3380 = vrcp.f32 %v2223_v16 }
 0x71d   : > { %v3373_v40 = vpop.eup %3372 }
 0x71e   : > { %v2238_v6 = vmul.f32 %v3373_v40, %v2215_v42  ;;  %v2221_v63 = vpop.xlane.xlu0 %2220  ;;  %v2227_v52 = vpop.xlane.xlu1 %2226 }
 0x71f   : > { %3382 = vrcp.f32 %v2221_v63 }
 0x720   : > { %v2246_v47 = vsub.f32 2.0, %v2238_v6  ;;  %3384 = vrcp.f32 %v2227_v52 }
 0x721   : > { %v3375_v13 = vpop.eup %3374 }
 0x722   : > { %v3377_v43 = vpop.eup %3376  ;;  %v2254_v0 = vmul.f32 %v3373_v40, %v2246_v47  ;;  %v1828_v2 = vmul.f32 %v3375_v13, %v1812_v31  ;;  %v2225_v3 = vpop.xlane.xlu0 %2224 }
 0x723   : > { %v1567_v45 = vpop.permute.xlu1 %1566  ;;  %v2240_v7 = vmul.f32 %v3377_v43, %v2219_v41  ;;  %3386 = vrcp.f32 %v2225_v3 }
 0x724   : > { %1591 = vst.msk [vmem:[%s3722_s24] sm:$0xff] %vm1590_vm2, %v1567_v45  ;;  %v1836_v58 = vsub.f32 2.0, %v1828_v2  ;;  %v2262_v37 = vmul.f32 %v4484_v22, %v2254_v0 }
 0x725   : > { %v3379_v54 = vpop.eup %3378  ;;  %v2248_v27 = vsub.f32 2.0, %v2240_v7 }
 0x726   : > { %v3381_v21 = vpop.eup %3380  ;;  %v1844_v51 = vmul.f32 %v3375_v13, %v1836_v58  ;;  %v2239_v26 = vmul.f32 %v3379_v54, %v2217_v19  ;;  %v2229_v44 = vpop.xlane.xlu0 %2228  ;;  %2975 = vmatprep.mubr.f32.mxu0 %v2262_v37 }
 0x727   : > { %v1571_v61 = vpop.permute.xlu1 %1570  ;;  %v2242_v11 = vmul.f32 %v3381_v21, %v2223_v16  ;;  %3388 = vrcp.f32 %v2229_v44  ;;  %v2256_v14 = vmul.f32 %v3377_v43, %v2248_v27 }
 0x728   : > { %1593 = vst.msk [vmem:[%s3722_s24 + $0x10] sm:$0xff] %vm1590_vm2, %v1571_v61  ;;  %v2247_v15 = vsub.f32 2.0, %v2239_v26  ;;  %v1852_v9 = vmul.f32 %v4490_v39, %v1844_v51 }
 0x729   : > { %v3383_v12 = vpop.eup %3382  ;;  %v2250_v22 = vsub.f32 2.0, %v2242_v11  ;;  %v2264_v29 = vmul.f32 %v4488_v30, %v2256_v14 }
 0x72a   : > { %v3385_v8 = vpop.eup %3384  ;;  %v2255_v20 = vmul.f32 %v3379_v54, %v2247_v15  ;;  %v2241_v28 = vmul.f32 %v3383_v12, %v2221_v63  ;;  %v1569_v49 = vpop.permute.xlu0 %1568  ;;  %2921 = vmatmul.mubr.f32.gmra.mrb[30].mxu1 %v1852_v9 }
 0x72b   : > { %v1573_v24 = vpop.permute.xlu1 %1572  ;;  %v2244_v25 = vmul.f32 %v3385_v8, %v2227_v52  ;;  %1592 = vst.msk [vmem:[%s3722_s24 + $0x8] sm:$0xff] %vm1590_vm2, %v1569_v49  ;;  %v2258_v35 = vmul.f32 %v3381_v21, %v2250_v22 }
 0x72c   : > { %1594 = vst.msk [vmem:[%s3722_s24 + $0x18] sm:$0xff] %vm1590_vm2, %v1573_v24  ;;  %v2263_v17 = vmul.f32 %v4494_v10, %v2255_v20  ;;  %v2249_v23 = vsub.f32 2.0, %v2241_v28 }
 0x72d   : > { %v3387_v39 = vpop.eup %3386  ;;  %v2252_v1 = vsub.f32 2.0, %v2244_v25  ;;  %v2266_v34 = vmul.f32 %v4496_v5, %v2258_v35 }
 0x72e   : > { %v2257_v46 = vmul.f32 %v3383_v12, %v2249_v23  ;;  %v2243_v53 = vmul.f32 %v3387_v39, %v2225_v3  ;;  %v1575_v48 = vpop.permute.xlu0 %1574  ;;  %2976 = vmatmul.mubr.f32.vlgmr.msra.gmra.mrb[24].mxu0 %v2263_v17 }
 0x72f   : > { %v1577_v57 = vpop.permute.xlu1 %1576  ;;  %1595 = vst.msk [vmem:[%s3722_s24 + $0x20] sm:$0xff] %vm1590_vm2, %v1575_v48  ;;  %2978 = vmatprep.mubr.f32.mxu0 %v2264_v29  ;;  %v2260_v60 = vmul.f32 %v3385_v8, %v2252_v1 }
 0x730   : > { %1596 = vst.msk [vmem:[%s3722_s24 + $0x28] sm:$0xff] %vm1590_vm2, %v1577_v57  ;;  %v2251_v56 = vsub.f32 2.0, %v2243_v53  ;;  %v2265_v10 = vmul.f32 %v4500_v62, %v2257_v46 }
 0x731   : > { %v3389_v4 = vpop.eup %3388  ;;  %v2268_v41 = vmul.f32 %v4502_v50, %v2260_v60 }
 0x732   : > { %v2259_v30 = vmul.f32 %v3387_v39, %v2251_v56  ;;  %v2245_v42 = vmul.f32 %v3389_v4, %v2229_v44  ;;  %v1579_v32 = vpop.permute.xlu0 %1578  ;;  %2979 = vmatmul.mubr.f32.gmra.mrb[26].mxu0 %v2265_v10 }
 0x733   : > { %v1581_v36 = vpop.permute.xlu1 %1580  ;;  %1597 = vst.msk [vmem:[%s3722_s24 + $0x30] sm:$0xff] %vm1590_vm2, %v1579_v32  ;;  %2981 = vmatprep.mubr.f32.mxu0 %v2266_v34 }
 0x734   : > { %1598 = vst.msk [vmem:[%s3722_s24 + $0x38] sm:$0xff] %vm1590_vm2, %v1581_v36  ;;  %v2253_v38 = vsub.f32 2.0, %v2245_v42  ;;  %v2267_v31 = vmul.f32 %v4506_v55, %v2259_v30 }
 0x736   : > { %v2261_v62 = vmul.f32 %v3389_v4, %v2253_v38  ;;  %2982 = vmatmul.mubr.f32.gmra.mrb[28].mxu0 %v2267_v31 }
 0x737   : > { %2984 = vmatprep.mubr.f32.mxu0 %v2268_v41 }
 0x738   : > { %v2269_v5 = vmul.f32 %v4509_v33, %v2261_v62 }
 0x73a   : > { %2985 = vmatmul.mubr.f32.gmra.mrb[30].mxu0 %v2269_v5 }
 0x7bc   : > { %v2913_v59 = vpop.f32.mrb[24].mxu1 }
 0x7bd   : > { %1985 = vrot.lane.b32.xlu1 %v2913_v59, %s3551_s3  ;;  %v1936_v18 = vpop.f32.mrb[25].mxu1 }
 0x7be   : > { %1983 = vrot.lane.b32.xlu0 %v1936_v18, %s3551_s3 }
 0x7c1   : > { %v2916_v19 = vpop.f32.mrb[26].mxu1 }
 0x7c2   : > { %1989 = vrot.lane.b32.xlu1 %v2916_v19, %s3551_s3  ;;  %v1946_v16 = vpop.f32.mrb[27].mxu1 }
 0x7c3   : > { %1987 = vrot.lane.b32.xlu0 %v1946_v16, %s3551_s3 }
 0x7e7   : > { %v2919_v55 = vpop.f32.mrb[28].mxu1 }
 0x7e8   : > { %1993 = vrot.lane.b32.xlu1 %v2919_v55, %s3551_s3  ;;  %v1956_v50 = vpop.f32.mrb[29].mxu1 }
 0x7e9   : > { %1991 = vrot.lane.b32.xlu0 %v1956_v50, %s3551_s3 }
 0x7fd   : > { %v2922_v33 = vpop.f32.mrb[30].mxu1 }
 0x7fe   : > { %1997 = vrot.lane.b32.xlu1 %v2922_v33, %s3551_s3  ;;  %v1966_v40 = vpop.f32.mrb[31].mxu1 }
 0x7ff   : > { %1995 = vrot.lane.b32.xlu0 %v1966_v40, %s3551_s3  ;;  %s3424_s3 = sshll.u32 %s3553_s4, 4  ;;  %s3425_s3 = int_to_ptr.vmem [resolvable:$false] %s3424_s3 }
 0x800   : > { %p3427_p1 = scmp.lt.s32.totalorder %s4612_s5, %s3425_s3 }
 0x801   : > { %v2977_v6 = vpop.f32.mrb[24].mxu0 }
 0x802   : > { %2402 = vrot.lane.b32.xlu1 %v2977_v6, %s3552_s18  ;;  %v2353_v63 = vpop.f32.mrb[25].mxu0 }
 0x803   : > { %2400 = vrot.lane.b32.xlu0 %v2353_v63, %s3552_s18 }
 0x805   : > { %v2980_v52 = vpop.f32.mrb[26].mxu0 }
 0x806   : > { %2406 = vrot.lane.b32.xlu1 %v2980_v52, %s3552_s18  ;;  %v2363_v47 = vpop.f32.mrb[27].mxu0 }
 0x807   : > { %2404 = vrot.lane.b32.xlu0 %v2363_v47, %s3552_s18 }
 0x809   : > { %v2983_v13 = vpop.f32.mrb[28].mxu0 }
 0x80a   : > { %2410 = vrot.lane.b32.xlu1 %v2983_v13, %s3552_s18  ;;  %v2373_v43 = vpop.f32.mrb[29].mxu0 }
 0x80b   : > { %2408 = vrot.lane.b32.xlu0 %v2373_v43, %s3552_s18 }
 0x80d   : > { %v2986_v0 = vpop.f32.mrb[30].mxu0 }
 0x80e   : > { %2414 = vrot.lane.b32.xlu1 %v2986_v0, %s3552_s18  ;;  %v2383_v2 = vpop.f32.mrb[31].mxu0 }
 0x80f   : > { %2412 = vrot.lane.b32.xlu0 %v2383_v2, %s3552_s18  ;;  %s3426_s18 = scalar_lea.vmem %s3425_s3, 2048 }
 0x810   : > { %p3428_p3 = scmp.lt.s32.totalorder %s3426_s18, %s3420_s21 }
 0x812   : > { %p3429_p8 = por %p3428_p3, %p3427_p1 }
 0x814   : > { %p3430_p10 = pnand %p3429_p8, %p3423_p0 }
 0x82f   : > { %v1986_v3 = vpop.permute.xlu1 %1985 }
 0x830   : > { %2009 = vst.msk [vmem:[%s3722_s24 + $0x8] sm:$0xff] %vm2007_vm3, %v1986_v3  ;;  %v1984_v45 = vpop.permute.xlu0 %1983 }
 0x831   : > { %2008 = vst.msk [vmem:[%s3722_s24] sm:$0xff] %vm2007_vm3, %v1984_v45 }
 0x834   : > { %v1990_v7 = vpop.permute.xlu1 %1989 }
 0x835   : > { %2011 = vst.msk [vmem:[%s3722_s24 + $0x18] sm:$0xff] %vm2007_vm3, %v1990_v7  ;;  %v1988_v58 = vpop.permute.xlu0 %1987 }
 0x836   : > { %2010 = vst.msk [vmem:[%s3722_s24 + $0x10] sm:$0xff] %vm2007_vm3, %v1988_v58 }
 0x85a   : > { %v1994_v37 = vpop.permute.xlu1 %1993 }
 0x85b   : > { %2013 = vst.msk [vmem:[%s3722_s24 + $0x28] sm:$0xff] %vm2007_vm3, %v1994_v37  ;;  %v1992_v54 = vpop.permute.xlu0 %1991 }
 0x85c   : > { %2012 = vst.msk [vmem:[%s3722_s24 + $0x20] sm:$0xff] %vm2007_vm3, %v1992_v54 }
 0x870   : > { %v1998_v27 = vpop.permute.xlu1 %1997 }
 0x871   : > { %2015 = vst.msk [vmem:[%s3722_s24 + $0x38] sm:$0xff] %vm2007_vm3, %v1998_v27  ;;  %v1996_v21 = vpop.permute.xlu0 %1995 }
 0x872   : > { %2014 = vst.msk [vmem:[%s3722_s24 + $0x30] sm:$0xff] %vm2007_vm3, %v1996_v21 }
 0x874   : > { %v2403_v51 = vpop.permute.xlu1 %2402 }
 0x875   : > { %2426 = vst.msk [vmem:[%s3722_s24 + $0x8] sm:$0xff] %vm2424_vm4, %v2403_v51  ;;  %v2401_v26 = vpop.permute.xlu0 %2400 }
 0x876   : > { %2425 = vst.msk [vmem:[%s3722_s24] sm:$0xff] %vm2424_vm4, %v2401_v26 }
 0x878   : > { %v2407_v44 = vpop.permute.xlu1 %2406 }
 0x879   : > { %2428 = vst.msk [vmem:[%s3722_s24 + $0x18] sm:$0xff] %vm2424_vm4, %v2407_v44  ;;  %v2405_v61 = vpop.permute.xlu0 %2404 }
 0x87a   : > { %2427 = vst.msk [vmem:[%s3722_s24 + $0x10] sm:$0xff] %vm2424_vm4, %v2405_v61 }
 0x87c   : > { %v2411_v11 = vpop.permute.xlu1 %2410 }
 0x87d   : > { %2430 = vst.msk [vmem:[%s3722_s24 + $0x28] sm:$0xff] %vm2424_vm4, %v2411_v11  ;;  %v2409_v15 = vpop.permute.xlu0 %2408 }
 0x87e   : > { %2429 = vst.msk [vmem:[%s3722_s24 + $0x20] sm:$0xff] %vm2424_vm4, %v2409_v15 }
 0x880   : > { %v2415_v9 = vpop.permute.xlu1 %2414 }
 0x881   : > { %2432 = vst.msk [vmem:[%s3722_s24 + $0x38] sm:$0xff] %vm2424_vm4, %v2415_v9  ;;  %v2413_v12 = vpop.permute.xlu0 %2412 }
 0x882   : > { %2431 = vst.msk [vmem:[%s3722_s24 + $0x30] sm:$0xff] %vm2424_vm4, %v2413_v12 }
 0x883   : > { %3433 = shalt.err (!%p3430_p10)
}
 0x884   : > { %s3434_s9 = scalar_lea.hbm %s4610_s26, 1024  ;;  %s3438_s25 = scalar_lea.hbm %s4682_s1, 4096 }
 0x885   : > { %p3435_p11 = scmp.ne.s32.totalorder %s4610_s26, %s3434_s9  ;;  %p3439_p6 = scmp.lt.u32.totalorder %s4610_s26, %s4682_s1 }
 0x886   : > { %p3440_p9 = scmp.lt.u32.totalorder %s3438_s25, %s3434_s9  ;;  %p3442_p7 = scmp.lt.u32.totalorder %s3434_s9, %s4610_s26 }
 0x887   : > { %p3436_p13 = pnand %p3435_p11, %p4690_p2 }
 0x888   : > { %p3441_p12 = por %p3440_p9, %p3439_p6 }
 0x889   : > { %p3437_p5 = pneg %p3436_p13 }
 0x88a   : > { %p3443_p4 = por %p3442_p7, %p3441_p12 }
 0x88c   : > { %p3444_p0 = pnand %p3443_p4, %p3437_p5 }
 0x88e   : > { %3447 = shalt.err (!%p3444_p0)
}
 0x88f   : > { %s3554_s12 = smov 128   ;;  %s3555_s13 = smov 8  }
 0x890   : > { %3152 = dma.vmem_to_hbm [thread:$0]  (%p4690_p2), %s4612_s5, 1024, %s4610_s26, %s4620_s17, %s3554_s12, %s3554_s12, %s3555_s13  }
 0x891 PF: > { %p3163_p1 = scmp.ge.s32.totalorder %s3542_s16, 2  ;;  %s2464_s21 = sand.u32 1, %s3502_s6  }
 0x892   : > { %p4691_p3 = scmp.ne.s32.totalorder %s4687_s2, 0  ;;  %s2465_s4 = scalar_lea.sflag [#allocation6], %s2464_s21 }
 0x894   : > { %p3159_p8 = pnand %p3163_p1, %p4691_p3 }
 0x896   : > { %3497 = dma.done.wait (!%p3159_p8), %s2465_s4, 1024  }
 0x897   : > { %3499 = vsyncadd (!%p3159_p8), %s2465_s4, 4294966272  ;;  %s17_s16 = sadd.s32 1, %s3542_s16   ;;  %s4692_s6 = smov %s3506_s7 }
 0x898   : > { %p14_p10 = scmp.ge.s32.totalorder %s17_s16, 6   ;;  %s4693_s7 = smov %s3510_s8 }
 0x899   : > { %s4694_s8 = smov %s3656_s30  ;;  %s4695_s9 = smov %s3518_s10 }
 0x89a   : > { %s4696_s10 = smov %s3522_s11  ;;  %s4697_s11 = smov %s3653_s29 }
 0x89b   : > { %s4698_s12 = smov %s3534_s14  ;;  %s4699_s13 = smov %s3538_s15 }
 0x89c   : > { %s4700_s14 = smov %s4703_s19  ;;  %s4701_s15 = smov %s4707_s20 }
 0x89d   :  { %16 = sbr.rel (!%p14_p10) target bundleno = 9 (0x9), region = 86 }
 0x8a4   :  { %2470 = vsyncpa [#allocation5], 1 }
 0x8a5   :  { %2472 = vsyncpa [#allocation5 + $0x1], 1 }
 0x8a6   :  { %2473 = vsyncpa [#allocation6], 1 }
 0x8a7   :  { %2475 = vsyncpa [#allocation6 + $0x1], 1 }

</bundles_post_ra>
